<compile_context>
chip_gen: v7x
topology: tpu7x:2x2x1
jax: 0.10.0
libtpu: 0.0.40
codegen_flags: <defaults>
</compile_context>

<pallas_src>
import functools

import jax
import jax.numpy as jnp
from jax.experimental import pallas as pl
from jax.experimental.pallas import tpu as pltpu


# ------------------------------ Pallas kernel ------------------------------ #

def fused_gcn_kernel(h0_ref, ei_ref, eemb_ref, wlin_ref, blin_ref, root_ref,
                     wej_ref, wee_ref, bedge_ref, out_ref,
                     h_s, xlin_s, gsrc_s, agg_s, deg_s, dis_s, *, d_real):
    p = pl.program_id(0)          # phase: 0 = degree pass, 1..L = GCN layers
    k = pl.program_id(1)          # edge tile index (reduction axis, last)
    nk = pl.num_programs(1)

    n_pad, d_pad = h_s.shape
    et = ei_ref.shape[1]

    row = ei_ref[0:1, :]                                            # [1, Et] sources
    col = ei_ref[1:2, :]                                            # [1, Et] targets
    node_ids = jax.lax.broadcasted_iota(jnp.int32, (n_pad, et), 0)
    # bf16 one-hot incidence slab for this edge tile (exact in bf16).
    row_oh = (node_ids == row).astype(jnp.bfloat16)                 # [N, Et]

    contract_n = (((0,), (0,)), ((), ()))                           # contract node dim

    # ------------------ phase 0: degree / normalization pass ------------------ #
    @pl.when(p == 0)
    def _():
        @pl.when(k == 0)
        def _():
            h_s[...] = h0_ref[...]
            deg_s[...] = jnp.zeros_like(deg_s)

        # out-degree contribution of this edge tile (lane reduce on the XLU)
        deg_s[...] += jnp.sum(row_oh.astype(jnp.float32), axis=1, keepdims=True)

        @pl.when(k == nk - 1)
        def _():
            dis_s[...] = jax.lax.rsqrt(deg_s[...] + 1.0)            # deg = degree + 1

    # ------------------ phases 1..L: one GCNConvEdge layer each --------------- #
    @pl.when(p > 0)
    def _():
        @pl.when(k == 0)
        def _():
            # x = Linear(h); stash dis in padding lane d_real of the gather source
            xlin = (jnp.dot(h_s[...].astype(jnp.bfloat16), wlin_ref[0],
                            preferred_element_type=jnp.float32) + blin_ref[0])
            xlin_s[...] = xlin
            lane = jax.lax.broadcasted_iota(jnp.int32, (n_pad, d_pad), 1)
            gsrc_s[...] = jnp.where(lane == d_real, dis_s[...], xlin
                                    ).astype(jnp.bfloat16)
            agg_s[...] = jnp.zeros_like(agg_s)

        # gather x_j (and dis[row[e]]) for this edge tile in one MXU pass
        xj = jax.lax.dot_general(row_oh, gsrc_s[...], contract_n,
                                 preferred_element_type=jnp.float32)  # [Et, Dp]
        dis_row = xj[:, d_real:d_real + 1]                            # [Et, 1]

        # message = relu(concat(x_j, edge_emb) @ W_edge + b); norm folded below
        msg = jnp.maximum(
            jnp.dot(xj.astype(jnp.bfloat16), wej_ref[0],
                    preferred_element_type=jnp.float32)
            + jnp.dot(eemb_ref[0], wee_ref[0],
                      preferred_element_type=jnp.float32)
            + bedge_ref[0],
            0.0)
        # put dis[row[e]] in padding lane d_real so the scatter matmul also yields
        #   s[n] = sum_{e: col[e]==n} dis[row[e]]   for free.
        lane_e = jax.lax.broadcasted_iota(jnp.int32, (et, d_pad), 1)
        msg = jnp.where(lane_e == d_real, dis_row, msg)

        col_oh = (node_ids == col).astype(jnp.bfloat16)               # [N, Et]
        agg_s[...] += jnp.dot(col_oh, msg.astype(jnp.bfloat16),
                              preferred_element_type=jnp.float32)

        @pl.when(k == nk - 1)
        def _():
            dis = dis_s[...]                                          # [N, 1]
            s_in = agg_s[:, d_real:d_real + 1]                        # Σ dis[row] over in-edges
            # norm contribution: Σ_e 1[col==n]·dis[row]·dis[col] = dis[n]·s_in[n]
            # self term: relu(x + root)/deg, with 1/deg = dis*dis (no divide)
            out = (agg_s[...] + dis * s_in
                   + jnp.maximum(xlin_s[...] + root_ref[0], 0.0) * (dis * dis))
            h_s[...] = jnp.maximum(out, 0.0)   # inter-layer ReLU (dead after last layer)
            out_ref[...] = out                 # final flush = last layer, no ReLU


# ------------------------------ host wrapper ------------------------------- #

def _round_up(x, m):
    return (x + m - 1) // m * m


def encode(tables, feats):
    """OGB-style Atom/Bond encoder: sum of per-feature embedding lookups."""
    out = 0.0
    for i, tbl in enumerate(tables):
        out = out + tbl[feats[:, i]]
    return out


def gnn_edge_based_forward(params, x, edge_index, edge_attr, batch, num_layer,
                           *, e_tile=512):
    """Fused forward: AtomEncoder on host, all GCNConvEdge layers in one kernel.

    e_tile: edge-tile width (multiple of 128).  Size against scoped VMEM per
    generation: ~256 on v5e (16 MiB default scoped), 512-1024 on v6e, <=512 on
    v7x (64 MiB physical / 32 MiB scoped).
    """
    del batch  # JK='last' node representation does not use batch
    h0 = encode(params["atom_tables"], x).astype(jnp.float32)        # [N, D]
    N, D = h0.shape
    E = edge_index.shape[1]
    L = num_layer

    f32, bf16 = jnp.float32, jnp.bfloat16
    d_pad = _round_up(D + 1, 128)          # +1 free lane carries deg^-1/2 through the MXU
    n_pad = _round_up(N, 8)
    et = min(e_tile, _round_up(E, 128))
    e_pad = _round_up(E, et)
    ke = e_pad // et

    h0p = jnp.zeros((n_pad, d_pad), f32).at[:N, :D].set(h0)
    # padded edges point at node id n_pad -> match no one-hot row -> contribute nothing
    eip = jnp.full((2, e_pad), n_pad, jnp.int32).at[:, :E].set(edge_index.astype(jnp.int32))

    def pad_mat(w):
        return jnp.zeros((d_pad, d_pad), f32).at[:D, :D].set(w)

    def pad_vec(b):
        return jnp.zeros((1, d_pad), f32).at[:, :D].set(b)

    eemb, wlin, blin, root, wej, wee, bedge = [], [], [], [], [], [], []
    for l in range(L):
        lp = params["layers"][l]
        ee = encode(lp["bond_tables"], edge_attr)                     # BondEncoder, [E, D]
        eemb.append(jnp.zeros((e_pad, d_pad), f32).at[:E, :D].set(ee))
        wlin.append(pad_mat(lp["W_lin"]))
        blin.append(pad_vec(lp["b_lin"]))
        root.append(pad_vec(lp["root"]))
        wej.append(pad_mat(lp["W_ej"]))
        wee.append(pad_mat(lp["W_ee"]))
        bedge.append(pad_vec(lp["b_edge"]))

    # bf16 for everything that feeds the MXU; biases stay f32 (added post-accumulate)
    eemb = jnp.stack(eemb).astype(bf16)            # [L, E_pad, D_pad]
    wlin = jnp.stack(wlin).astype(bf16)            # [L, D_pad, D_pad]
    wej = jnp.stack(wej).astype(bf16)
    wee = jnp.stack(wee).astype(bf16)
    blin = jnp.stack(blin)                         # [L, 1, D_pad] f32
    root = jnp.stack(root)
    bedge = jnp.stack(bedge)

    def layer_of(p):                               # phase 0 = degree pass -> layer 0 slot
        return jnp.maximum(p - 1, 0)

    kern = functools.partial(fused_gcn_kernel, d_real=D)
    out = pl.pallas_call(
        kern,
        out_shape=jax.ShapeDtypeStruct((n_pad, d_pad), f32),
        grid=(L + 1, ke),
        in_specs=[
            pl.BlockSpec((n_pad, d_pad), lambda p, k: (0, 0)),                 # h0
            pl.BlockSpec((2, et), lambda p, k: (0, k)),                        # edge_index tile
            pl.BlockSpec((1, et, d_pad), lambda p, k: (layer_of(p), k, 0)),    # edge emb tile
            pl.BlockSpec((1, d_pad, d_pad), lambda p, k: (layer_of(p), 0, 0)),  # W_lin
            pl.BlockSpec((1, 1, d_pad), lambda p, k: (layer_of(p), 0, 0)),      # b_lin
            pl.BlockSpec((1, 1, d_pad), lambda p, k: (layer_of(p), 0, 0)),      # root_emb
            pl.BlockSpec((1, d_pad, d_pad), lambda p, k: (layer_of(p), 0, 0)),  # W_edge (x_j half)
            pl.BlockSpec((1, d_pad, d_pad), lambda p, k: (layer_of(p), 0, 0)),  # W_edge (emb half)
            pl.BlockSpec((1, 1, d_pad), lambda p, k: (layer_of(p), 0, 0)),      # b_edge
        ],
        out_specs=pl.BlockSpec((n_pad, d_pad), lambda p, k: (0, 0)),
        scratch_shapes=[
            pltpu.VMEM((n_pad, d_pad), f32),    # h (resident across layers)
            pltpu.VMEM((n_pad, d_pad), f32),    # xlin (current layer)
            pltpu.VMEM((n_pad, d_pad), bf16),   # gather source [xlin | dis]
            pltpu.VMEM((n_pad, d_pad), f32),    # agg accumulator
            pltpu.VMEM((n_pad, 1), f32),        # degree accumulator
            pltpu.VMEM((n_pad, 1), f32),        # dis = deg^-1/2
        ],
        compiler_params=pltpu.CompilerParams(
            dimension_semantics=("arbitrary", "arbitrary")),
    )(h0p, eip, eemb, wlin, blin, root, wej, wee, bedge)

    return out[:N, :D]


# -------------------------------- reference -------------------------------- #

def ref_layer(h, ei, eemb, W_lin, b_lin, root, W_ej, W_ee, b_edge, apply_relu):
    row, col = ei[0], ei[1]
    xlin = h @ W_lin + b_lin
    deg = jnp.zeros((h.shape[0],), jnp.float32).at[row].add(1.0) + 1.0
    dis = 1.0 / jnp.sqrt(deg)
    norm = dis[row] * dis[col]
    x_j = xlin[row]
    msg = jax.nn.relu(x_j @ W_ej + eemb @ W_ee + b_edge) + norm[:, None]
    agg = jnp.zeros_like(xlin).at[col].add(msg)
    out = agg + jax.nn.relu(xlin + root) / deg[:, None]
    return jax.nn.relu(out) if apply_relu else out


def ref_forward(params, x, edge_index, edge_attr, batch, num_layer):
    del batch
    h = encode(params["atom_tables"], x)
    for layer in range(num_layer):
        p = params["layers"][layer]
        edge_emb = encode(p["bond_tables"], edge_attr)
        h = ref_layer(h, edge_index, edge_emb,
                      p["W_lin"], p["b_lin"], p["root"],
                      p["W_ej"], p["W_ee"], p["b_edge"],
                      layer != num_layer - 1)
    return h


# ----------------------------------- main ----------------------------------- #

if __name__ == "__main__":
    key = jax.random.PRNGKey(0)
    N, E, D = 16, 32, 32          # nodes, directed edges, emb_dim
    NUM_LAYER = 3
    ATOM_VOCABS = [8, 4, 6, 6, 5, 4, 4, 2, 2]   # 9 atom categorical features
    BOND_VOCABS = [5, 6, 2]                     # 3 bond categorical features

    def uni(k, shape, scale):
        return jax.random.uniform(k, shape, jnp.float32, -scale, scale)

    keys = iter(jax.random.split(key, 200))
    params = {
        "atom_tables": [jax.random.normal(next(keys), (v, D), jnp.float32) * 0.1
                        for v in ATOM_VOCABS],
        "layers": [],
    }
    for _ in range(NUM_LAYER):
        s = 1.0 / (D ** 0.5)
        s2 = 1.0 / ((2 * D) ** 0.5)
        params["layers"].append({
            "bond_tables": [jax.random.normal(next(keys), (v, D), jnp.float32) * 0.1
                            for v in BOND_VOCABS],
            "W_lin": uni(next(keys), (D, D), s),
            "b_lin": uni(next(keys), (1, D), s),
            "root": jax.random.normal(next(keys), (1, D), jnp.float32),
            "W_ej": uni(next(keys), (D, D), s2),   # W_edge[:D]
            "W_ee": uni(next(keys), (D, D), s2),   # W_edge[D:]
            "b_edge": uni(next(keys), (1, D), s2),
        })

    # deterministic example inputs
    kx, ke, ka = jax.random.split(next(keys), 3)
    x = jnp.stack([jax.random.randint(jax.random.fold_in(kx, i), (N,), 0, v)
                   for i, v in enumerate(ATOM_VOCABS)], axis=1).astype(jnp.int32)
    edge_index = jax.random.randint(ke, (2, E), 0, N, jnp.int32)
    edge_attr = jnp.stack([jax.random.randint(jax.random.fold_in(ka, i), (E,), 0, v)
                           for i, v in enumerate(BOND_VOCABS)], axis=1).astype(jnp.int32)
    batch = jnp.zeros((N,), jnp.int32)

    out = gnn_edge_based_forward(params, x, edge_index, edge_attr, batch, NUM_LAYER)
    out = jax.block_until_ready(out)

    ref = ref_forward(params, x, edge_index, edge_attr, batch, NUM_LAYER)
    assert out.shape == (N, D)
    # bf16 MXU operands (f32 accumulation) vs. the pure-f32 reference
    assert jnp.allclose(out, ref, atol=5e-2, rtol=5e-2), "mismatch vs. JAX reference"

    print("KERNEL_OK")
</pallas_src>

<mosaic_0001>
module attributes {stable_mosaic.version = 11 : i64} {
  func.func @fused_gcn_kernel(%arg0: i32, %arg1: i32, %arg2: memref<16x128xf32, #tpu.memory_space<vmem>>, %arg3: memref<2x128xi32, #tpu.memory_space<vmem>>, %arg4: memref<1x128x128xbf16, #tpu.memory_space<vmem>>, %arg5: memref<1x128x128xbf16, #tpu.memory_space<vmem>>, %arg6: memref<1x1x128xf32, #tpu.memory_space<vmem>>, %arg7: memref<1x1x128xf32, #tpu.memory_space<vmem>>, %arg8: memref<1x128x128xbf16, #tpu.memory_space<vmem>>, %arg9: memref<1x128x128xbf16, #tpu.memory_space<vmem>>, %arg10: memref<1x1x128xf32, #tpu.memory_space<vmem>>, %arg11: memref<16x128xf32, #tpu.memory_space<vmem>>, %arg12: memref<16x128xf32, #tpu.memory_space<vmem>>, %arg13: memref<16x128xf32, #tpu.memory_space<vmem>>, %arg14: memref<16x128xbf16, #tpu.memory_space<vmem>>, %arg15: memref<16x128xf32, #tpu.memory_space<vmem>>, %arg16: memref<16x1xf32, #tpu.memory_space<vmem>>, %arg17: memref<16x1xf32, #tpu.memory_space<vmem>>) attributes {dimension_semantics = [#tpu.dimension_semantics<arbitrary>, #tpu.dimension_semantics<arbitrary>], iteration_bounds = array<i64: 4, 1>, scalar_prefetch = 0 : i64, scratch_operands = 6 : i64, tpu.core_type = #tpu.core_type<tc>, window_params = [{pipeline_mode = #tpu.pipeline_mode<synchronous>, transform_indices = @transform_0, window_bounds = array<i64: 16, 128>}, {transform_indices = @transform_1, window_bounds = array<i64: 2, 128>}, {transform_indices = @transform_2, window_bounds = array<i64: 1, 128, 128>}, {transform_indices = @transform_3, window_bounds = array<i64: 1, 128, 128>}, {transform_indices = @transform_4, window_bounds = array<i64: 1, 1, 128>}, {transform_indices = @transform_5, window_bounds = array<i64: 1, 1, 128>}, {transform_indices = @transform_6, window_bounds = array<i64: 1, 128, 128>}, {transform_indices = @transform_7, window_bounds = array<i64: 1, 128, 128>}, {transform_indices = @transform_8, window_bounds = array<i64: 1, 1, 128>}, {pipeline_mode = #tpu.pipeline_mode<synchronous>, transform_indices = @transform_9, window_bounds = array<i64: 16, 128>}]} {
    %c0 = arith.constant 0 : index
    %c0_0 = arith.constant 0 : index
    %0 = vector.load %arg3[%c0, %c0_0] : memref<2x128xi32, #tpu.memory_space<vmem>>, vector<1x128xi32>
    %c1 = arith.constant 1 : index
    %c0_1 = arith.constant 0 : index
    %1 = vector.load %arg3[%c1, %c0_1] : memref<2x128xi32, #tpu.memory_space<vmem>>, vector<1x128xi32>
    %2 = tpu.iota {dimensions = array<i32: 0>} : vector<16x128xi32>
    %3 = vector.broadcast %0 : vector<1x128xi32> to vector<16x128xi32>
    %4 = arith.cmpi eq, %2, %3 : vector<16x128xi32>
    %5 = arith.extui %4 : vector<16x128xi1> to vector<16x128xi32>
    %6 = arith.sitofp %5 : vector<16x128xi32> to vector<16x128xf32>
    %7 = arith.truncf %6 : vector<16x128xf32> to vector<16x128xbf16>
    %c0_i32 = arith.constant 0 : i32
    %8 = arith.cmpi eq, %arg0, %c0_i32 : i32
    %9 = arith.extui %8 : i1 to i32
    %c0_i32_2 = arith.constant 0 : i32
    %10 = arith.cmpi ne, %9, %c0_i32_2 : i32
    scf.if %10 {
      %c0_i32_5 = arith.constant 0 : i32
      %14 = arith.cmpi eq, %arg1, %c0_i32_5 : i32
      %15 = arith.extui %14 : i1 to i32
      %c0_i32_6 = arith.constant 0 : i32
      %16 = arith.cmpi ne, %15, %c0_i32_6 : i32
      scf.if %16 {
        %c0_13 = arith.constant 0 : index
        %c0_14 = arith.constant 0 : index
        %26 = vector.load %arg2[%c0_13, %c0_14] : memref<16x128xf32, #tpu.memory_space<vmem>>, vector<16x128xf32>
        %c0_15 = arith.constant 0 : index
        %c0_16 = arith.constant 0 : index
        %27 = vector.load %arg12[%c0_15, %c0_16] : memref<16x128xf32, #tpu.memory_space<vmem>>, vector<16x128xf32>
        tpu.vector_store %arg12[%c0_15, %c0_16], %26 {strides = array<i32>} : memref<16x128xf32, #tpu.memory_space<vmem>>, vector<16x128xf32>,
        %cst_17 = arith.constant 0.000000e+00 : f32
        %28 = vector.broadcast %cst_17 : f32 to vector<16x1xf32>
        %c0_18 = arith.constant 0 : index
        %c0_19 = arith.constant 0 : index
        %29 = vector.load %arg16[%c0_18, %c0_19] : memref<16x1xf32, #tpu.memory_space<vmem>>, vector<16x1xf32>
        tpu.vector_store %arg16[%c0_18, %c0_19], %28 {strides = array<i32>} : memref<16x1xf32, #tpu.memory_space<vmem>>, vector<16x1xf32>,
      } else {
      }
      %c0_7 = arith.constant 0 : index
      %c0_8 = arith.constant 0 : index
      %17 = vector.load %arg16[%c0_7, %c0_8] : memref<16x1xf32, #tpu.memory_space<vmem>>, vector<16x1xf32>
      %18 = arith.extf %7 : vector<16x128xbf16> to vector<16x128xf32>
      %cst = arith.constant dense<0.000000e+00> : vector<16xf32>
      %19 = vector.multi_reduction <add>, %18, %cst [1] : vector<16x128xf32> to vector<16xf32>
      %20 = vector.shape_cast %19 : vector<16xf32> to vector<16x1xf32>
      %21 = arith.addf %17, %20 : vector<16x1xf32>
      %c0_9 = arith.constant 0 : index
      %c0_10 = arith.constant 0 : index
      %22 = vector.load %arg16[%c0_9, %c0_10] : memref<16x1xf32, #tpu.memory_space<vmem>>, vector<16x1xf32>
      tpu.vector_store %arg16[%c0_9, %c0_10], %21 {strides = array<i32>} : memref<16x1xf32, #tpu.memory_space<vmem>>, vector<16x1xf32>,
      %c0_i32_11 = arith.constant 0 : i32
      %23 = arith.cmpi eq, %arg1, %c0_i32_11 : i32
      %24 = arith.extui %23 : i1 to i32
      %c0_i32_12 = arith.constant 0 : i32
      %25 = arith.cmpi ne, %24, %c0_i32_12 : i32
      scf.if %25 {
        %c0_13 = arith.constant 0 : index
        %c0_14 = arith.constant 0 : index
        %26 = vector.load %arg16[%c0_13, %c0_14] : memref<16x1xf32, #tpu.memory_space<vmem>>, vector<16x1xf32>
        %cst_15 = arith.constant 1.000000e+00 : f32
        %27 = vector.broadcast %cst_15 : f32 to vector<16x1xf32>
        %28 = arith.addf %26, %27 : vector<16x1xf32>
        %29 = math.rsqrt %28 : vector<16x1xf32>
        %c0_16 = arith.constant 0 : index
        %c0_17 = arith.constant 0 : index
        %30 = vector.load %arg17[%c0_16, %c0_17] : memref<16x1xf32, #tpu.memory_space<vmem>>, vector<16x1xf32>
        tpu.vector_store %arg17[%c0_16, %c0_17], %29 {strides = array<i32>} : memref<16x1xf32, #tpu.memory_space<vmem>>, vector<16x1xf32>,
      } else {
      }
    } else {
    }
    %c0_i32_3 = arith.constant 0 : i32
    %11 = arith.cmpi sgt, %arg0, %c0_i32_3 : i32
    %12 = arith.extui %11 : i1 to i32
    %c0_i32_4 = arith.constant 0 : i32
    %13 = arith.cmpi ne, %12, %c0_i32_4 : i32
    scf.if %13 {
      %c0_i32_5 = arith.constant 0 : i32
      %14 = arith.cmpi eq, %arg1, %c0_i32_5 : i32
      %15 = arith.extui %14 : i1 to i32
      %c0_i32_6 = arith.constant 0 : i32
      %16 = arith.cmpi ne, %15, %c0_i32_6 : i32
      scf.if %16 {
        %c0_31 = arith.constant 0 : index
        %c0_32 = arith.constant 0 : index
        %55 = vector.load %arg12[%c0_31, %c0_32] : memref<16x128xf32, #tpu.memory_space<vmem>>, vector<16x128xf32>
        %56 = arith.truncf %55 : vector<16x128xf32> to vector<16x128xbf16>
        %c0_33 = arith.constant 0 : index
        %c0_34 = arith.constant 0 : index
        %c0_35 = arith.constant 0 : index
        %57 = vector.load %arg5[%c0_33, %c0_34, %c0_35] : memref<1x128x128xbf16, #tpu.memory_space<vmem>>, vector<1x128x128xbf16>
        %58 = vector.shape_cast %57 : vector<1x128x128xbf16> to vector<128x128xbf16>
        %cst_36 = arith.constant dense<0.000000e+00> : vector<16x128xf32>
        %59 = tpu.matmul %56, %58, %cst_36 {dimension_numbers = #tpu.dot_dimension_numbers<[1], [0], [0], [1], [0, 0, 1, 1], [], []>} : vector<16x128xbf16>, vector<128x128xbf16>, vector<16x128xf32> -> vector<16x128xf32>
        %c0_37 = arith.constant 0 : index
        %c0_38 = arith.constant 0 : index
        %c0_39 = arith.constant 0 : index
        %60 = vector.load %arg6[%c0_37, %c0_38, %c0_39] : memref<1x1x128xf32, #tpu.memory_space<vmem>>, vector<1x1x128xf32>
        %61 = vector.shape_cast %60 : vector<1x1x128xf32> to vector<1x128xf32>
        %62 = vector.broadcast %61 : vector<1x128xf32> to vector<16x128xf32>
        %63 = arith.addf %59, %62 : vector<16x128xf32>
        %c0_40 = arith.constant 0 : index
        %c0_41 = arith.constant 0 : index
        %64 = vector.load %arg13[%c0_40, %c0_41] : memref<16x128xf32, #tpu.memory_space<vmem>>, vector<16x128xf32>
        tpu.vector_store %arg13[%c0_40, %c0_41], %63 {strides = array<i32>} : memref<16x128xf32, #tpu.memory_space<vmem>>, vector<16x128xf32>,
        %65 = tpu.iota {dimensions = array<i32: 1>} : vector<16x128xi32>
        %c32_i32_42 = arith.constant 32 : i32
        %66 = vector.broadcast %c32_i32_42 : i32 to vector<16x128xi32>
        %67 = arith.cmpi eq, %65, %66 : vector<16x128xi32>
        %c0_43 = arith.constant 0 : index
        %c0_44 = arith.constant 0 : index
        %68 = vector.load %arg17[%c0_43, %c0_44] : memref<16x1xf32, #tpu.memory_space<vmem>>, vector<16x1xf32>
        %69 = vector.shape_cast %68 : vector<16x1xf32> to vector<16x1xf32>
        %70 = vector.broadcast %69 : vector<16x1xf32> to vector<16x128xf32>
        %71 = arith.select %67, %70, %63 : vector<16x128xi1>, vector<16x128xf32>
        %72 = arith.truncf %71 : vector<16x128xf32> to vector<16x128xbf16>
        %c0_45 = arith.constant 0 : index
        %c0_46 = arith.constant 0 : index
        %73 = vector.load %arg14[%c0_45, %c0_46] : memref<16x128xbf16, #tpu.memory_space<vmem>>, vector<16x128xbf16>
        tpu.vector_store %arg14[%c0_45, %c0_46], %72 {strides = array<i32>} : memref<16x128xbf16, #tpu.memory_space<vmem>>, vector<16x128xbf16>,
        %cst_47 = arith.constant 0.000000e+00 : f32
        %74 = vector.broadcast %cst_47 : f32 to vector<16x128xf32>
        %c0_48 = arith.constant 0 : index
        %c0_49 = arith.constant 0 : index
        %75 = vector.load %arg15[%c0_48, %c0_49] : memref<16x128xf32, #tpu.memory_space<vmem>>, vector<16x128xf32>
        tpu.vector_store %arg15[%c0_48, %c0_49], %74 {strides = array<i32>} : memref<16x128xf32, #tpu.memory_space<vmem>>, vector<16x128xf32>,
      } else {
      }
      %c0_7 = arith.constant 0 : index
      %c0_8 = arith.constant 0 : index
      %17 = vector.load %arg14[%c0_7, %c0_8] : memref<16x128xbf16, #tpu.memory_space<vmem>>, vector<16x128xbf16>
      %cst = arith.constant dense<0.000000e+00> : vector<128x128xf32>
      %18 = tpu.matmul %7, %17, %cst {dimension_numbers = #tpu.dot_dimension_numbers<[0], [0], [1], [1], [0, 1, 1, 1], [], []>} : vector<16x128xbf16>, vector<16x128xbf16>, vector<128x128xf32> -> vector<128x128xf32>
      %19 = vector.extract_strided_slice %18 {offsets = [0, 32], sizes = [128, 1], strides = [1, 1]} : vector<128x128xf32> to vector<128x1xf32>
      %20 = arith.truncf %18 : vector<128x128xf32> to vector<128x128xbf16>
      %c0_9 = arith.constant 0 : index
      %c0_10 = arith.constant 0 : index
      %c0_11 = arith.constant 0 : index
      %21 = vector.load %arg8[%c0_9, %c0_10, %c0_11] : memref<1x128x128xbf16, #tpu.memory_space<vmem>>, vector<1x128x128xbf16>
      %22 = vector.shape_cast %21 : vector<1x128x128xbf16> to vector<128x128xbf16>
      %cst_12 = arith.constant dense<0.000000e+00> : vector<128x128xf32>
      %23 = tpu.matmul %20, %22, %cst_12 {dimension_numbers = #tpu.dot_dimension_numbers<[1], [0], [0], [1], [0, 0, 1, 1], [], []>} : vector<128x128xbf16>, vector<128x128xbf16>, vector<128x128xf32> -> vector<128x128xf32>
      %c0_13 = arith.constant 0 : index
      %c0_14 = arith.constant 0 : index
      %c0_15 = arith.constant 0 : index
      %24 = vector.load %arg4[%c0_13, %c0_14, %c0_15] : memref<1x128x128xbf16, #tpu.memory_space<vmem>>, vector<1x128x128xbf16>
      %25 = vector.shape_cast %24 : vector<1x128x128xbf16> to vector<128x128xbf16>
      %c0_16 = arith.constant 0 : index
      %c0_17 = arith.constant 0 : index
      %c0_18 = arith.constant 0 : index
      %26 = vector.load %arg9[%c0_16, %c0_17, %c0_18] : memref<1x128x128xbf16, #tpu.memory_space<vmem>>, vector<1x128x128xbf16>
      %27 = vector.shape_cast %26 : vector<1x128x128xbf16> to vector<128x128xbf16>
      %cst_19 = arith.constant dense<0.000000e+00> : vector<128x128xf32>
      %28 = tpu.matmul %25, %27, %cst_19 {dimension_numbers = #tpu.dot_dimension_numbers<[1], [0], [0], [1], [0, 0, 1, 1], [], []>} : vector<128x128xbf16>, vector<128x128xbf16>, vector<128x128xf32> -> vector<128x128xf32>
      %29 = arith.addf %23, %28 : vector<128x128xf32>
      %c0_20 = arith.constant 0 : index
      %c0_21 = arith.constant 0 : index
      %c0_22 = arith.constant 0 : index
      %30 = vector.load %arg10[%c0_20, %c0_21, %c0_22] : memref<1x1x128xf32, #tpu.memory_space<vmem>>, vector<1x1x128xf32>
      %31 = vector.shape_cast %30 : vector<1x1x128xf32> to vector<1x128xf32>
      %32 = vector.broadcast %31 : vector<1x128xf32> to vector<128x128xf32>
      %33 = arith.addf %29, %32 : vector<128x128xf32>
      %cst_23 = arith.constant 0.000000e+00 : f32
      %34 = vector.broadcast %cst_23 : f32 to vector<128x128xf32>
      %35 = arith.maximumf %33, %34 : vector<128x128xf32>
      %36 = tpu.iota {dimensions = array<i32: 1>} : vector<128x128xi32>
      %c32_i32 = arith.constant 32 : i32
      %37 = vector.broadcast %c32_i32 : i32 to vector<128x128xi32>
      %38 = arith.cmpi eq, %36, %37 : vector<128x128xi32>
      %39 = vector.shape_cast %19 : vector<128x1xf32> to vector<128x1xf32>
      %40 = vector.broadcast %39 : vector<128x1xf32> to vector<128x128xf32>
      %41 = arith.select %38, %40, %35 : vector<128x128xi1>, vector<128x128xf32>
      %42 = vector.broadcast %1 : vector<1x128xi32> to vector<16x128xi32>
      %43 = arith.cmpi eq, %2, %42 : vector<16x128xi32>
      %44 = arith.extui %43 : vector<16x128xi1> to vector<16x128xi32>
      %45 = arith.sitofp %44 : vector<16x128xi32> to vector<16x128xf32>
      %46 = arith.truncf %45 : vector<16x128xf32> to vector<16x128xbf16>
      %c0_24 = arith.constant 0 : index
      %c0_25 = arith.constant 0 : index
      %47 = vector.load %arg15[%c0_24, %c0_25] : memref<16x128xf32, #tpu.memory_space<vmem>>, vector<16x128xf32>
      %48 = arith.truncf %41 : vector<128x128xf32> to vector<128x128xbf16>
      %cst_26 = arith.constant dense<0.000000e+00> : vector<16x128xf32>
      %49 = tpu.matmul %46, %48, %cst_26 {dimension_numbers = #tpu.dot_dimension_numbers<[1], [0], [0], [1], [0, 0, 1, 1], [], []>} : vector<16x128xbf16>, vector<128x128xbf16>, vector<16x128xf32> -> vector<16x128xf32>
      %50 = arith.addf %47, %49 : vector<16x128xf32>
      %c0_27 = arith.constant 0 : index
      %c0_28 = arith.constant 0 : index
      %51 = vector.load %arg15[%c0_27, %c0_28] : memref<16x128xf32, #tpu.memory_space<vmem>>, vector<16x128xf32>
      tpu.vector_store %arg15[%c0_27, %c0_28], %50 {strides = array<i32>} : memref<16x128xf32, #tpu.memory_space<vmem>>, vector<16x128xf32>,
      %c0_i32_29 = arith.constant 0 : i32
      %52 = arith.cmpi eq, %arg1, %c0_i32_29 : i32
      %53 = arith.extui %52 : i1 to i32
      %c0_i32_30 = arith.constant 0 : i32
      %54 = arith.cmpi ne, %53, %c0_i32_30 : i32
      scf.if %54 {
        %c0_31 = arith.constant 0 : index
        %c0_32 = arith.constant 0 : index
        %55 = vector.load %arg17[%c0_31, %c0_32] : memref<16x1xf32, #tpu.memory_space<vmem>>, vector<16x1xf32>
        %c0_33 = arith.constant 0 : index
        %c32 = arith.constant 32 : index
        %56 = vector.load %arg15[%c0_33, %c32] : memref<16x128xf32, #tpu.memory_space<vmem>>, vector<16x1xf32>
        %c0_34 = arith.constant 0 : index
        %c0_35 = arith.constant 0 : index
        %57 = vector.load %arg15[%c0_34, %c0_35] : memref<16x128xf32, #tpu.memory_space<vmem>>, vector<16x128xf32>
        %58 = arith.mulf %55, %56 : vector<16x1xf32>
        %59 = vector.broadcast %58 : vector<16x1xf32> to vector<16x128xf32>
        %60 = arith.addf %57, %59 : vector<16x128xf32>
        %c0_36 = arith.constant 0 : index
        %c0_37 = arith.constant 0 : index
        %61 = vector.load %arg13[%c0_36, %c0_37] : memref<16x128xf32, #tpu.memory_space<vmem>>, vector<16x128xf32>
        %c0_38 = arith.constant 0 : index
        %c0_39 = arith.constant 0 : index
        %c0_40 = arith.constant 0 : index
        %62 = vector.load %arg7[%c0_38, %c0_39, %c0_40] : memref<1x1x128xf32, #tpu.memory_space<vmem>>, vector<1x1x128xf32>
        %63 = vector.shape_cast %62 : vector<1x1x128xf32> to vector<1x128xf32>
        %64 = vector.broadcast %63 : vector<1x128xf32> to vector<16x128xf32>
        %65 = arith.addf %61, %64 : vector<16x128xf32>
        %cst_41 = arith.constant 0.000000e+00 : f32
        %66 = vector.broadcast %cst_41 : f32 to vector<16x128xf32>
        %67 = arith.maximumf %65, %66 : vector<16x128xf32>
        %68 = arith.mulf %55, %55 : vector<16x1xf32>
        %69 = vector.broadcast %68 : vector<16x1xf32> to vector<16x128xf32>
        %70 = arith.mulf %67, %69 : vector<16x128xf32>
        %71 = arith.addf %60, %70 : vector<16x128xf32>
        %cst_42 = arith.constant 0.000000e+00 : f32
        %72 = vector.broadcast %cst_42 : f32 to vector<16x128xf32>
        %73 = arith.maximumf %71, %72 : vector<16x128xf32>
        %c0_43 = arith.constant 0 : index
        %c0_44 = arith.constant 0 : index
        %74 = vector.load %arg12[%c0_43, %c0_44] : memref<16x128xf32, #tpu.memory_space<vmem>>, vector<16x128xf32>
        tpu.vector_store %arg12[%c0_43, %c0_44], %73 {strides = array<i32>} : memref<16x128xf32, #tpu.memory_space<vmem>>, vector<16x128xf32>,
        %c0_45 = arith.constant 0 : index
        %c0_46 = arith.constant 0 : index
        %75 = vector.load %arg11[%c0_45, %c0_46] : memref<16x128xf32, #tpu.memory_space<vmem>>, vector<16x128xf32>
        tpu.vector_store %arg11[%c0_45, %c0_46], %71 {strides = array<i32>} : memref<16x128xf32, #tpu.memory_space<vmem>>, vector<16x128xf32>,
      } else {
      }
    } else {
    }
    return
  }
  func.func @transform_0(%arg0: i32, %arg1: i32) -> (i32, i32) {
    %c0_i32 = arith.constant 0 : i32
    %c0_i32_0 = arith.constant 0 : i32
    %c0_i32_1 = arith.constant 0 : i32
    return %c0_i32, %c0_i32_0 : i32, i32
  }
  func.func @transform_1(%arg0: i32, %arg1: i32) -> (i32, i32) {
    %c0_i32 = arith.constant 0 : i32
    %c0_i32_0 = arith.constant 0 : i32
    return %c0_i32, %arg1 : i32, i32
  }
  func.func @transform_2(%arg0: i32, %arg1: i32) -> (i32, i32, i32) {
    %c1_i32 = arith.constant 1 : i32
    %0 = arith.subi %arg0, %c1_i32 : i32
    %c0_i32 = arith.constant 0 : i32
    %1 = arith.maxsi %0, %c0_i32 : i32
    %c0_i32_0 = arith.constant 0 : i32
    %c0_i32_1 = arith.constant 0 : i32
    return %1, %arg1, %c0_i32_0 : i32, i32, i32
  }
  func.func @transform_3(%arg0: i32, %arg1: i32) -> (i32, i32, i32) {
    %c1_i32 = arith.constant 1 : i32
    %0 = arith.subi %arg0, %c1_i32 : i32
    %c0_i32 = arith.constant 0 : i32
    %1 = arith.maxsi %0, %c0_i32 : i32
    %c0_i32_0 = arith.constant 0 : i32
    %c0_i32_1 = arith.constant 0 : i32
    %c0_i32_2 = arith.constant 0 : i32
    return %1, %c0_i32_0, %c0_i32_1 : i32, i32, i32
  }
  func.func @transform_4(%arg0: i32, %arg1: i32) -> (i32, i32, i32) {
    %c1_i32 = arith.constant 1 : i32
    %0 = arith.subi %arg0, %c1_i32 : i32
    %c0_i32 = arith.constant 0 : i32
    %1 = arith.maxsi %0, %c0_i32 : i32
    %c0_i32_0 = arith.constant 0 : i32
    %c0_i32_1 = arith.constant 0 : i32
    %c0_i32_2 = arith.constant 0 : i32
    return %1, %c0_i32_0, %c0_i32_1 : i32, i32, i32
  }
  func.func @transform_5(%arg0: i32, %arg1: i32) -> (i32, i32, i32) {
    %c1_i32 = arith.constant 1 : i32
    %0 = arith.subi %arg0, %c1_i32 : i32
    %c0_i32 = arith.constant 0 : i32
    %1 = arith.maxsi %0, %c0_i32 : i32
    %c0_i32_0 = arith.constant 0 : i32
    %c0_i32_1 = arith.constant 0 : i32
    %c0_i32_2 = arith.constant 0 : i32
    return %1, %c0_i32_0, %c0_i32_1 : i32, i32, i32
  }
  func.func @transform_6(%arg0: i32, %arg1: i32) -> (i32, i32, i32) {
    %c1_i32 = arith.constant 1 : i32
    %0 = arith.subi %arg0, %c1_i32 : i32
    %c0_i32 = arith.constant 0 : i32
    %1 = arith.maxsi %0, %c0_i32 : i32
    %c0_i32_0 = arith.constant 0 : i32
    %c0_i32_1 = arith.constant 0 : i32
    %c0_i32_2 = arith.constant 0 : i32
    return %1, %c0_i32_0, %c0_i32_1 : i32, i32, i32
  }
  func.func @transform_7(%arg0: i32, %arg1: i32) -> (i32, i32, i32) {
    %c1_i32 = arith.constant 1 : i32
    %0 = arith.subi %arg0, %c1_i32 : i32
    %c0_i32 = arith.constant 0 : i32
    %1 = arith.maxsi %0, %c0_i32 : i32
    %c0_i32_0 = arith.constant 0 : i32
    %c0_i32_1 = arith.constant 0 : i32
    %c0_i32_2 = arith.constant 0 : i32
    return %1, %c0_i32_0, %c0_i32_1 : i32, i32, i32
  }
  func.func @transform_8(%arg0: i32, %arg1: i32) -> (i32, i32, i32) {
    %c1_i32 = arith.constant 1 : i32
    %0 = arith.subi %arg0, %c1_i32 : i32
    %c0_i32 = arith.constant 0 : i32
    %1 = arith.maxsi %0, %c0_i32 : i32
    %c0_i32_0 = arith.constant 0 : i32
    %c0_i32_1 = arith.constant 0 : i32
    %c0_i32_2 = arith.constant 0 : i32
    return %1, %c0_i32_0, %c0_i32_1 : i32, i32, i32
  }
  func.func @transform_9(%arg0: i32, %arg1: i32) -> (i32, i32) {
    %c0_i32 = arith.constant 0 : i32
    %c0_i32_0 = arith.constant 0 : i32
    %c0_i32_1 = arith.constant 0 : i32
    return %c0_i32, %c0_i32_0 : i32, i32
  }
}

</mosaic_0001>

<bundles_post_ra>
// kernel: tpu_custom_call.1
= control target key start
LH: loop header
LB: loop body
LE: loop exit
PB: predicated region body
PF: predicated region fallthrough
CT: control target
= control target key end

     0   :  { %s3227_s0 = inlined_call_operand.hbm [shape: f32[16,128], index: 0, kind: input, shape index: {}]   ;;  %s3228_s1 = inlined_call_operand.hbm [shape: s32[2,128], index: 1, kind: input, shape index: {}]   ;;  %s3229_s2 = inlined_call_operand.hbm [shape: bf16[3,128,128], index: 2, kind: input, shape index: {}]   ;;  %s3230_s3 = inlined_call_operand.hbm [shape: bf16[3,128,128], index: 3, kind: input, shape index: {}]   ;;  %s3231_s4 = inlined_call_operand.vmem [shape: f32[3,1,128], index: 4, kind: input, shape index: {}]   ;;  %s3232_s5 = inlined_call_operand.vmem [shape: f32[3,1,128], index: 5, kind: input, shape index: {}]   ;;  %s3233_s6 = inlined_call_operand.hbm [shape: bf16[3,128,128], index: 6, kind: input, shape index: {}]   ;;  %s3234_s7 = inlined_call_operand.hbm [shape: bf16[3,128,128], index: 7, kind: input, shape index: {}]   ;;  %s3235_s8 = inlined_call_operand.vmem [shape: f32[3,1,128], index: 8, kind: input, shape index: {}]   ;;  %s3236_s9 = inlined_call_operand.hbm [shape: f32[16,128], index: 9, kind: output, shape index: {}]  }
   0x1   :  { %3251 = sst [smem:[#allocation26_spill]] %s3227_s0 }
   0x2   :  { %3252 = sst [smem:[#allocation27_spill]] %s3229_s2 }
   0x3   :  { %3253 = sst [smem:[#allocation28_spill]] %s3230_s3 }
   0x4   :  { %3254 = sst [smem:[#allocation29_spill]] %s3233_s6 }
   0x5   :  { %3255 = sst [smem:[#allocation30_spill]] %s3236_s9 }
   0x6   :  { %14 = vsyncpa [#allocation9], 0 }
   0x7   :  { %15 = vsyncpa [#allocation12], 0 }
   0x8   :  { %16 = vsyncpa [#allocation10], 0  ;;  %s2691_s30 = smov 0   ;;  %s2693_s10 = smov 0  }
   0x9   :  { %s2695_s11 = smov 0   ;;  %s2697_s12 = smov 0  }
   0xa   :  { %s2699_s13 = smov 0   ;;  %s2701_s14 = smov 0  }
   0xb LB: > { %3256 = sst [smem:[#allocation22_spill]] %s2614_s13  ;;  %s2720_s15 = sadd.s32 4294967295, %s2618_s14   ;;  %s2618_s14 = sphi %s2701_s14, %s22_s14   ;;  %s2614_s13 = sphi %s2699_s13, %s3286_s13   ;;  %s2610_s12 = sphi %s2697_s12, %s3290_s12   ;;  %s2606_s11 = sphi %s2695_s11, %s3289_s11   ;;  %s2602_s10 = sphi %s2693_s10, %s3288_s10   ;;  %s2598_s30 = sphi %s2691_s30, %s3287_s30  }
   0xc   : > { %3257 = sst [smem:[#allocation23_spill]] %s2618_s14  ;;  %p103_p0 = scmp.ne.s32.totalorder %s2606_s11, %s2602_s10 }
   0xd   : > { %p104_p1 = scmp.eq.s32.totalorder %s2618_s14, 0  ;;  %p109_p2 = scmp.ne.s32.totalorder %s2602_s10, %s2598_s30 }
   0xe   : > { %p3237_p3 = scmp.eq.s32.totalorder %s2720_s15, 0  ;;  %p1849_p5 = scmp.ge.s32.totalorder %s2618_s14, 1 }
   0xf   : > { %p105_p4 = por %p104_p1, %p103_p0  ;;  %p333_p7 = scmp.lt.s32.totalorder %s2618_s14, 5 }
  0x10   : > { %p2731_p6 = por %p3237_p3, %p109_p2  ;;  %s2620_s19 = smov [#allocation8]  }
  0x11   : > { %p2736_p8 = pnand %p1849_p5, %p333_p7  ;;  %s345_s20 = sshll.u32 %s2620_s19, 4  ;;  %s346_s20 = int_to_ptr.vmem [resolvable:$true] %s345_s20 }
  0x12   : > { %s3258_s17 = scalar_select %p2731_p6, 1, 0 }
  0x13   : > { %s3259_s18 = scalar_select %p2736_p8, 1, 0 }
  0x14   : > { %p2178_p9 = pneg %p2736_p8  ;;  %p2200_p10 = scmp.lt.s32.totalorder %s2618_s14, 4 }
  0x15   : > { %s34_s23 = sadd.s32 1, %s2614_s13  ;;  %s3262_s0 = sld [smem:[#allocation26_spill]] }
  0x16   : > { %p2745_p11 = pnand %p2178_p9, %p3237_p3  ;;  %p2749_p12 = pnand %p2200_p10, %p105_p4 }
  0x18   : > { %s3260_s21 = scalar_select %p2745_p11, 1, 0 }
  0x19   : > { %s3261_s22 = scalar_select %p2749_p12, 1, 0 }
  0x1a   : > { %p3245_p0 = pneg %p2745_p11 }
  0x1b   : > { %s2354_s26 = scalar_lea.hbm %s3262_s0, 256 }
  0x1c   : > { %p2355_p13 = scmp.ne.s32.totalorder %s3262_s0, %s2354_s26  ;;  %p2361_p4 = scmp.lt.u32.totalorder %s2354_s26, %s3262_s0 }
  0x1e   : > { %p2357_p1 = pnand %p3245_p0, %p2355_p13 }
  0x20   : > { %p2358_p2 = pneg %p2357_p1 }
  0x22   : > { %p2363_p5 = pnand %p2361_p4, %p2358_p2 }
  0x24   : > { %2366 = shalt.err (!%p2363_p5)
}
  0x25   : > { %s2367_s19 = scalar_lea.vmem %s346_s20, 256  ;;  %p2375_p3 = scmp.lt.s32.totalorder %s346_s20, %s346_s20 }
  0x26   : > { %p2368_p7 = scmp.ne.s32.totalorder %s346_s20, %s2367_s19  ;;  %p2376_p6 = scmp.lt.s32.totalorder %s2367_s19, %s2367_s19 }
  0x28   : > { %p2370_p9 = pnand %p2368_p7, %p3245_p0  ;;  %p2377_p8 = por %p2376_p6, %p2375_p3 }
  0x2a   : > { %p2371_p10 = pneg %p2370_p9 }
  0x2c   : > { %p2378_p12 = pnand %p2377_p8, %p2371_p10 }
  0x2e   : > { %2381 = shalt.err (!%p2378_p12)
}
  0x2f   : > { %s2621_s24 = smov 128   ;;  %s2622_s25 = smov 8  }
  0x30   : > { %2181 = dma.hbm_to_vmem [thread:$0]  (!%p2745_p11), %s3262_s0, 256, %s346_s20, [#allocation9], %s2621_s24, %s2621_s24, %s2622_s25  }
  0x31   : > { %p36_p13 = scmp.ge.s32.totalorder %s34_s23, 4  ;;  %s1835_s28 = sadd.s32 4294967295, %s2614_s13 }
  0x32   : > { %s372_s29 = sand.u32 1, %s2618_s14   ;;  %p86_p3 = scmp.gt.s32.totalorder %s1835_s28, 0 }
  0x33   : > { %s3292_s23 = smov (%p36_p13, %s34_s23), 0  ;;  %s374_s19 = sand.u32 1, %s2606_s11  }
  0x34   : > { %3263 = sst [smem:[#allocation24_spill]] %s3292_s23  ;;  %s1836_s30 = sadd.s32 4294967295, %s3292_s23 }
  0x35   : > { %s3294_s28 = smov (!%p86_p3, %s1835_s28), 0  ;;  %p89_p6 = scmp.gt.s32.totalorder %s1836_s30, 0 }
  0x36   : > { %s2782_s16 = sshll.u32 %s374_s19, 6  ;;  %s2784_s9 = sshll.u32 %s3294_s28, 10 }
  0x37   : > { %s3296_s30 = smov (!%p89_p6, %s1836_s30), 0  ;;  %s3264_s2 = sld [smem:[#allocation27_spill]] }
  0x38   : > { %s376_s26 = scalar_lea.vmem [#allocation13], %s2782_s16  ;;  %s91_s0 = ssub.s32 %s3294_s28, %s3296_s30 }
  0x39   : > { %s388_s27 = sshll.u32 %s376_s26, 4  ;;  %p94_p8 = scmp.eq.s32.totalorder %s91_s0, 0  ;;  %s2793_s27 = int_to_ptr.vmem [resolvable:$true] %s388_s27 }
  0x3a   : > { %s3265_s19 = sadd.s32 1, %s2606_s11  ;;  %s2800_s13 = scalar_lea.sflag [#allocation9], %s372_s29 }
  0x3b   : > { %s2798_s23 = scalar_select %p94_p8, %s2606_s11, %s3265_s19  }
  0x3c   : > { %p3267_p1 = scmp.ne.s32.totalorder %s3261_s22, 0 }
  0x3d   : > { %s2790_s25 = scalar_lea.hbm %s3264_s2, %s2784_s9  ;;  %3266 = sst [smem:[#allocation25_spill]] %s2798_s23 }
  0x3e   : > { %s2382_s14 = scalar_lea.hbm %s2790_s25, 1024  ;;  %p2806_p2 = pneg %p3267_p1 }
  0x3f   : > { %p2383_p12 = scmp.ne.s32.totalorder %s2790_s25, %s2382_s14  ;;  %s2387_s0 = scalar_lea.hbm %s3264_s2, 3072 }
  0x40   : > { %s3268_s20 = scalar_select %p2806_p2, 1, 0 }
  0x41   : > { %p2385_p4 = pnand %p2806_p2, %p2383_p12  ;;  %p2388_p7 = scmp.lt.u32.totalorder %s2790_s25, %s3264_s2 }
  0x42   : > { %p2389_p9 = scmp.lt.u32.totalorder %s2387_s0, %s2382_s14  ;;  %p2391_p13 = scmp.lt.u32.totalorder %s2382_s14, %s2790_s25 }
  0x43   : > { %p2386_p5 = pneg %p2385_p4 }
  0x44   : > { %p2390_p10 = por %p2389_p9, %p2388_p7 }
  0x46   : > { %p2392_p3 = por %p2391_p13, %p2390_p10 }
  0x48   : > { %p2393_p6 = pnand %p2392_p3, %p2386_p5 }
  0x4a   : > { %2396 = shalt.err (!%p2393_p6)
}
  0x4b   : > { %s2397_s29 = scalar_lea.vmem %s2793_s27, 1024  ;;  %s2623_s19 = smov [#allocation13]  }
  0x4c   : > { %p2398_p8 = scmp.ne.s32.totalorder %s2793_s27, %s2397_s29  ;;  %s2402_s28 = sshll.u32 %s2623_s19, 4  ;;  %s2403_s28 = int_to_ptr.vmem [resolvable:$false] %s2402_s28 }
  0x4d   : > { %s2404_s30 = scalar_lea.vmem %s2403_s28, 2048  ;;  %p2405_p0 = scmp.lt.s32.totalorder %s2793_s27, %s2403_s28 }
  0x4e   : > { %p2400_p12 = pnand %p2398_p8, %p2806_p2  ;;  %p2406_p11 = scmp.lt.s32.totalorder %s2404_s30, %s2397_s29 }
  0x50   : > { %p2401_p4 = pneg %p2400_p12  ;;  %p2407_p7 = por %p2406_p11, %p2405_p0 }
  0x52   : > { %p2408_p9 = pnand %p2407_p7, %p2401_p4 }
  0x54   : > { %2411 = shalt.err (!%p2408_p9)
}
  0x55   : > { %s2624_s14 = smov 64   ;;  %s2625_s0 = smov 4  }
  0x56   : > { %2188 = dma.hbm_to_vmem [thread:$0]  (!%p3267_p1), %s2790_s25, 1024, %s2793_s27, %s2800_s13, %s2624_s14, %s2624_s14, %s2625_s0  }
  0x57   : > { %s3269_s3 = sld [smem:[#allocation28_spill]]  ;;  %s402_s19 = scalar_lea.vmem [#allocation14], %s2782_s16 }
  0x58   : > { %s412_s28 = sshll.u32 %s402_s19, 4  ;;  %s2840_s28 = int_to_ptr.vmem [resolvable:$true] %s412_s28 }
  0x5d   : > { %s2837_s29 = scalar_lea.hbm %s3269_s3, %s2784_s9  ;;  %s2417_s27 = scalar_lea.hbm %s3269_s3, 3072 }
  0x5e   : > { %s2412_s30 = scalar_lea.hbm %s2837_s29, 1024  ;;  %p2418_p10 = scmp.lt.u32.totalorder %s2837_s29, %s3269_s3 }
  0x5f   : > { %p2413_p11 = scmp.ne.s32.totalorder %s2837_s29, %s2412_s30  ;;  %p2419_p13 = scmp.lt.u32.totalorder %s2417_s27, %s2412_s30 }
  0x60   : > { %p2421_p6 = scmp.lt.u32.totalorder %s2412_s30, %s2837_s29 }
  0x61   : > { %p2415_p0 = pnand %p2413_p11, %p2806_p2  ;;  %p2420_p3 = por %p2419_p13, %p2418_p10 }
  0x63   : > { %p2416_p5 = pneg %p2415_p0  ;;  %p2422_p8 = por %p2421_p6, %p2420_p3 }
  0x65   : > { %p2423_p12 = pnand %p2422_p8, %p2416_p5 }
  0x67   : > { %2426 = shalt.err (!%p2423_p12)
}
  0x68   : > { %s2427_s19 = scalar_lea.vmem %s2840_s28, 1024  ;;  %s2626_s2 = smov [#allocation14]  }
  0x69   : > { %p2428_p4 = scmp.ne.s32.totalorder %s2840_s28, %s2427_s19  ;;  %s2432_s25 = sshll.u32 %s2626_s2, 4  ;;  %s2433_s25 = int_to_ptr.vmem [resolvable:$false] %s2432_s25 }
  0x6a   : > { %s2434_s24 = scalar_lea.vmem %s2433_s25, 2048  ;;  %p2435_p11 = scmp.lt.s32.totalorder %s2840_s28, %s2433_s25 }
  0x6b   : > { %p2430_p7 = pnand %p2428_p4, %p2806_p2  ;;  %p2436_p0 = scmp.lt.s32.totalorder %s2434_s24, %s2427_s19 }
  0x6d   : > { %p2431_p9 = pneg %p2430_p7  ;;  %p2437_p10 = por %p2436_p0, %p2435_p11 }
  0x6f   : > { %p2438_p13 = pnand %p2437_p10, %p2431_p9 }
  0x71   : > { %2441 = shalt.err (!%p2438_p13)
}
  0x72   : > { %2191 = dma.hbm_to_vmem [thread:$0]  (!%p3267_p1), %s2837_s29, 1024, %s2840_s28, %s2800_s13, %s2624_s14, %s2624_s14, %s2625_s0  }
  0x73   : > { %s3270_s6 = sld [smem:[#allocation29_spill]]  ;;  %s450_s19 = scalar_lea.vmem [#allocation15], %s2782_s16 }
  0x74   : > { %s460_s2 = sshll.u32 %s450_s19, 4  ;;  %s2874_s2 = int_to_ptr.vmem [resolvable:$true] %s460_s2 }
  0x79   : > { %s2871_s26 = scalar_lea.hbm %s3270_s6, %s2784_s9  ;;  %s2447_s28 = scalar_lea.hbm %s3270_s6, 3072 }
  0x7a   : > { %s2442_s25 = scalar_lea.hbm %s2871_s26, 1024  ;;  %p2448_p8 = scmp.lt.u32.totalorder %s2871_s26, %s3270_s6 }
  0x7b   : > { %p2443_p5 = scmp.ne.s32.totalorder %s2871_s26, %s2442_s25  ;;  %p2449_p12 = scmp.lt.u32.totalorder %s2447_s28, %s2442_s25 }
  0x7c   : > { %p2451_p7 = scmp.lt.u32.totalorder %s2442_s25, %s2871_s26 }
  0x7d   : > { %p2445_p3 = pnand %p2443_p5, %p2806_p2  ;;  %p2450_p4 = por %p2449_p12, %p2448_p8 }
  0x7f   : > { %p2446_p6 = pneg %p2445_p3  ;;  %p2452_p9 = por %p2451_p7, %p2450_p4 }
  0x81   : > { %p2453_p11 = pnand %p2452_p9, %p2446_p6 }
  0x83   : > { %2456 = shalt.err (!%p2453_p11)
}
  0x84   : > { %s2457_s19 = scalar_lea.vmem %s2874_s2, 1024  ;;  %s2627_s24 = smov [#allocation15]  }
  0x85   : > { %p2458_p0 = scmp.ne.s32.totalorder %s2874_s2, %s2457_s19  ;;  %s2462_s29 = sshll.u32 %s2627_s24, 4  ;;  %s2463_s29 = int_to_ptr.vmem [resolvable:$false] %s2462_s29 }
  0x86   : > { %s2464_s30 = scalar_lea.vmem %s2463_s29, 2048  ;;  %p2465_p5 = scmp.lt.s32.totalorder %s2874_s2, %s2463_s29 }
  0x87   : > { %p2460_p10 = pnand %p2458_p0, %p2806_p2  ;;  %p2466_p3 = scmp.lt.s32.totalorder %s2464_s30, %s2457_s19 }
  0x89   : > { %p2461_p13 = pneg %p2460_p10  ;;  %p2467_p8 = por %p2466_p3, %p2465_p5 }
  0x8b   : > { %p2468_p12 = pnand %p2467_p8, %p2461_p13 }
  0x8d   : > { %2471 = shalt.err (!%p2468_p12)
}
  0x8e   : > { %2194 = dma.hbm_to_vmem [thread:$0]  (!%p3267_p1), %s2871_s26, 1024, %s2874_s2, %s2800_s13, %s2624_s14, %s2624_s14, %s2625_s0  }
  0x8f   : > { %s2628_s25 = smov [#allocation11]   ;;  %s2905_s19 = scalar_lea.hbm %s3234_s7, %s2784_s9 }
  0x90   : > { %s361_s28 = sshll.u32 %s2628_s25, 4  ;;  %s2472_s3 = scalar_lea.hbm %s3228_s1, 32  ;;  %s362_s28 = int_to_ptr.vmem [resolvable:$true] %s361_s28 }
  0x91   : > { %p2473_p6 = scmp.ne.s32.totalorder %s3228_s1, %s2472_s3  ;;  %p3271_p4 = scmp.ne.s32.totalorder %s3260_s21, 0 }
  0x92   : > { %p2479_p0 = scmp.lt.u32.totalorder %s2472_s3, %s3228_s1 }
  0x93   : > { %p3272_p7 = pneg %p3271_p4 }
  0x95   : > { %p2475_p9 = pnand %p2473_p6, %p3272_p7 }
  0x97   : > { %p2476_p11 = pneg %p2475_p9 }
  0x99   : > { %p2481_p10 = pnand %p2479_p0, %p2476_p11 }
  0x9b   : > { %2484 = shalt.err (!%p2481_p10)
}
  0x9c   : > { %s2485_s9 = scalar_lea.vmem %s362_s28, 32  ;;  %p3273_p5 = pmov %p3272_p7 }
  0x9d   : > { %p2486_p13 = scmp.ne.s32.totalorder %s362_s28, %s2485_s9  ;;  %p2493_p12 = scmp.lt.s32.totalorder %s362_s28, %s362_s28 }
  0x9e   : > { %p2494_p1 = scmp.lt.s32.totalorder %s2485_s9, %s2485_s9 }
  0x9f   : > { %p2488_p3 = pnand %p2486_p13, %p3273_p5 }
  0xa0   : > { %p2495_p2 = por %p2494_p1, %p2493_p12 }
  0xa1   : > { %p2489_p8 = pneg %p2488_p3 }
  0xa3   : > { %p2496_p6 = pnand %p2495_p2, %p2489_p8 }
  0xa5   : > { %2499 = shalt.err (!%p2496_p6)
}
  0xa6   : > { %2184 = dma.hbm_to_vmem [thread:$0]  (!%p3271_p4), %s3228_s1, 32, %s362_s28, [#allocation12]  }
  0xa7   : > { %s474_s3 = scalar_lea.vmem [#allocation16], %s2782_s16  ;;  %s2500_s27 = scalar_lea.hbm %s2905_s19, 1024 }
  0xa8   : > { %s484_s25 = sshll.u32 %s474_s3, 4  ;;  %p2501_p1 = scmp.ne.s32.totalorder %s2905_s19, %s2500_s27  ;;  %s2928_s25 = int_to_ptr.vmem [resolvable:$true] %s484_s25 }
  0xa9   : > { %p3274_p2 = scmp.ne.s32.totalorder %s3268_s20, 0  ;;  %s2505_s29 = scalar_lea.hbm %s3234_s7, 3072 }
  0xaa   : > { %p2506_p11 = scmp.lt.u32.totalorder %s2905_s19, %s3234_s7  ;;  %p2507_p0 = scmp.lt.u32.totalorder %s2505_s29, %s2500_s27 }
  0xab   : > { %p2503_p7 = pnand %p2501_p1, %p3274_p2  ;;  %p2509_p4 = scmp.lt.u32.totalorder %s2500_s27, %s2905_s19 }
  0xac   : > { %p2508_p10 = por %p2507_p0, %p2506_p11 }
  0xad   : > { %p2504_p9 = pneg %p2503_p7 }
  0xae   : > { %p2510_p13 = por %p2509_p4, %p2508_p10 }
  0xb0   : > { %p2511_p5 = pnand %p2510_p13, %p2504_p9 }
  0xb2   : > { %2514 = shalt.err (!%p2511_p5)
}
  0xb3   : > { %s2515_s16 = scalar_lea.vmem %s2928_s25, 1024  ;;  %s2629_s28 = smov [#allocation16]  }
  0xb4   : > { %p2516_p3 = scmp.ne.s32.totalorder %s2928_s25, %s2515_s16  ;;  %s2520_s2 = sshll.u32 %s2629_s28, 4  ;;  %s2521_s2 = int_to_ptr.vmem [resolvable:$false] %s2520_s2 }
  0xb5   : > { %s2522_s9 = scalar_lea.vmem %s2521_s2, 2048  ;;  %p2523_p6 = scmp.lt.s32.totalorder %s2928_s25, %s2521_s2 }
  0xb6   : > { %p2518_p8 = pnand %p2516_p3, %p3274_p2  ;;  %p2524_p1 = scmp.lt.s32.totalorder %s2522_s9, %s2515_s16 }
  0xb8   : > { %p2519_p12 = pneg %p2518_p8  ;;  %p2525_p7 = por %p2524_p1, %p2523_p6 }
  0xba   : > { %p2526_p11 = pnand %p2525_p7, %p2519_p12 }
  0xbc   : > { %2529 = shalt.err (!%p2526_p11)
}
  0xbd   : > { %p3275_p9 = scmp.ne.s32.totalorder %s3261_s22, 0  ;;  %p3276_p2 = scmp.ne.s32.totalorder %s3259_s18, 0 }
  0xbe   : > { %p3277_p0 = scmp.eq.s32.totalorder (!%p3276_p2), %s2720_s15, 0 }
  0xbf   : > { %2197 = dma.hbm_to_vmem [thread:$0]  (!%p3275_p9), %s2905_s19, 1024, %s2928_s25, %s2800_s13, %s2624_s14, %s2624_s14, %s2625_s0  }
  0xc0   : > { %508 = sbr.rel (%p3276_p2) target bundleno = 1616 (0x650), region = 56 }
  0xc7   : > { %2581 = dma.done.wait (%p3277_p0), [#allocation9], 256   ;;  %p3278_p10 = pmov %p3277_p0 }
  0xc8   : > { %p3279_p4 = pmov %p3277_p0 }
  0xc9   : > { %2583 = vsyncadd (%p3278_p10), [#allocation9], 4294967040 }
  0xca   : > { %2585 = dma.done.wait (%p3279_p4), [#allocation12], 32   ;;  %p3280_p13 = pmov %p3277_p0 }
  0xcb   : > { %s518_s22 = sand.u32 1, %s2720_s15   ;;  %s520_s13 = sand.u32 1, %s2602_s10  }
  0xcc   : > { %2587 = vsyncadd (%p3280_p13), [#allocation12], 4294967264  ;;  %s1872_s20 = sshll.u32 %s520_s13, 6  ;;  %s519_s18 = scalar_lea.sflag [#allocation9], %s518_s22 }
  0xcd   : > { %s2967_s14 = scalar_lea.vmem [#allocation13], %s1872_s20  ;;  %p3281_p5 = scmp.ne.s32.totalorder %s3258_s17, 0 }
  0xcf   : > { %2589 = dma.done.wait (%p3281_p5), %s519_s18, 4096  }
  0xd0   : > { %2591 = vsyncadd (%p3281_p5), %s519_s18, 4294963200  ;;  %v655_v0 = vlaneseq  ;;  %s1876_s0 = sadd.s32 4294967295, %s2610_s12  ;;  %v1894_v3 = vld [vmem:[#allocation11] ss:$0 sm:$0xff]  ;;  %v2982_v4 = vld [vmem:[#allocation11 + $0x1] ss:$0 sm:$0xff] }
  0xd1   : > { %p620_p3 = scmp.gt.s32.totalorder %s1876_s0, 0  ;;  %p1877_p8 = scmp.lt.s32.totalorder %s1876_s0, 2  ;;  %v2630_v5 = vmov 0.0  }
  0xd2   : > { %v2975_v1 = vshrl.u32 %v655_v0, 7  ;;  %s3004_s29 = scalar_lea.vmem [#allocation14], %s1872_s20  ;;  %s3006_s30 = scalar_lea.vmem [#allocation15], %s1872_s20 }
  0xd3   : > { %s3298_s0 = smov (!%p620_p3, %s1876_s0), 0  ;;  %s3008_s26 = scalar_lea.vmem [#allocation16], %s1872_s20 }
  0xd4   : > { %v2978_v2 = vadd.s32 8, %v2975_v1  ;;  %s3300_s0 = smov (!%p1877_p8, %s3298_s0), 2  ;;  %vm662_vm0 = vcmp.eq.s32.totalorder %v2975_v1, %v1894_v3  ;;  %p1897_p12 = scmp.ne.s32.totalorder %s2610_s12, 0 }
  0xd5   : > { %s624_s6 = scalar_lea.vmem %s3231_s4, %s3300_s0  ;;  %s633_s25 = scalar_lea.vmem %s3232_s5, %s3300_s0  ;;  %v2994_v6 = vsel %vm662_vm0, 1.0, %v2630_v5  ;;  %vm681_vm2 = vcmask (!%p1897_p12), 7168   ;;  %v2631_v9 = vmov (!%p1897_p12), 0.0   ;;  %v677_v10 = vld [vmem:[#allocation8] sm:$0xff] (!%p1897_p12)  ;;  %v678_v11 = vld [vmem:[#allocation8 + $0x8] sm:$0xff] (!%p1897_p12) }
  0xd6   : > { %vm663_vm1 = vcmp.eq.s32.totalorder %v2978_v2, %v1894_v3  ;;  %s648_s24 = scalar_lea.vmem %s3235_s8, %s3300_s0  ;;  %672 = sbr.rel (%p1897_p12) target bundleno = 384 (0x180), region = 84  ;;  %688 = vadd.xlane.f32.xlu0 (!%p1897_p12), %v2994_v6  ;;  %682 = vst.msk [vmem:[#allocation6] sm:$0xff] (!%p1897_p12), %vm681_vm2, %v2631_v9  ;;  %683 = vst.msk [vmem:[#allocation6 + $0x8] sm:$0xff] (!%p1897_p12), %vm681_vm2, %v2631_v9 }
  0xd7   : > { %v2996_v7 = vsel %vm663_vm1, 1.0, %v2630_v5  ;;  %679 = vst [vmem:[#allocation2] sm:$0xff] (!%p1897_p12), %v677_v10  ;;  %680 = vst [vmem:[#allocation2 + $0x8] sm:$0xff] (!%p1897_p12), %v678_v11 }
  0xd8   : > { %v668_v8 = vpack.c.bf16 %v2996_v7, %v2994_v6 }
  0xda   : > { %690 = vadd.xlane.f32.xlu0 (!%p1897_p12), %v2996_v7 }
  0xdd   : > { %v684_v12 = vld [vmem:[#allocation6] sm:$0xff]  ;;  %v685_v15 = vld [vmem:[#allocation6 + $0x8] sm:$0xff] }
 0x163   : > { %v689_v13 = vpop.xlane.xlu0 %688 }
 0x164   : > { %v692_v14 = vadd.f32 %v689_v13, %v684_v12 }
 0x166   : > { %695 = vst.msk [vmem:[#allocation6] sm:$0xff] %vm681_vm2, %v692_v14 }
 0x167   : > { %v691_v16 = vpop.xlane.xlu0 %690 }
 0x168   : > { %v693_v17 = vadd.f32 %v691_v16, %v685_v15 }
 0x16a   : > { %696 = vst.msk [vmem:[#allocation6 + $0x8] sm:$0xff] %vm681_vm2, %v693_v17 }
 0x16d   : > { %v700_v18 = vld [vmem:[#allocation6] sm:$0xff] }
 0x16e   : > { %v702_v19 = vadd.f32 1.0, %v700_v18 }
 0x170   : > { %2270 = vrsqrt.f32 %v702_v19 }
 0x171   : > { %v701_v20 = vld [vmem:[#allocation6 + $0x8] sm:$0xff] }
 0x172   : > { %v703_v21 = vadd.f32 1.0, %v701_v20 }
 0x174   : > { %2272 = vrsqrt.f32 %v703_v21 }
 0x17a   : > { %v2271_v22 = vpop.eup %2270 }
 0x17b   : > { %706 = vst.msk [vmem:[#allocation7] sm:$0xff] %vm681_vm2, %v2271_v22 }
 0x17e   : > { %v2273_v23 = vpop.eup %2272 }
 0x17f   : > { %707 = vst.msk [vmem:[#allocation7 + $0x8] sm:$0xff] %vm681_vm2, %v2273_v23 }
 0x180 PF: > { %p1898_p6 = scmp.le.s32.totalorder %s2610_s12, 0 }
 0x181   : > { %v2322_v24 = vld [vmem:[%s3004_s29] sm:$0xff] (!%p1898_p6)   ;;  %v2632_v25 = vmov (!%p1898_p6), 0.0   ;;  %v2323_v26 = vld [vmem:[%s3004_s29 + $0x8] sm:$0xff] (!%p1898_p6)   ;;  %vm2633_vm3 = vmmov (!%p1898_p6), 0   ;;  %v2634_v27 = vmov (!%p1898_p6), 0   ;;  %v2324_v28 = vld [vmem:[%s3004_s29 + $0x10] sm:$0xff] (!%p1898_p6)   ;;  %vm1529_vm6 = vcmp.eq.s32.totalorder (!%p1898_p6), %v2975_v1, %v2982_v4 }
 0x182   : > { %711 = sbr.rel (%p1898_p6) target bundleno = 1584 (0x630), region = 96  ;;  %2020 = vmatprep.subr.bf16.mxu0 (!%p1898_p6), %v2632_v25  ;;  %2036 = vmatprep.mubr.msk.bf16.mxu0 (!%p1898_p6), %vm2633_vm3, %v2632_v25  ;;  %v2325_v29 = vld [vmem:[%s3004_s29 + $0x18] sm:$0xff] (!%p1898_p6)   ;;  %v2326_v33 = vld [vmem:[%s3004_s29 + $0x20] sm:$0xff] (!%p1898_p6)   ;;  %v2327_v34 = vld [vmem:[%s3004_s29 + $0x28] sm:$0xff] (!%p1898_p6)   ;;  %vm871_vm4 = vcmask (!%p1898_p6), 130048   ;;  %v3075_v5 = vand.u32 (!%p1898_p6), 127, %v655_v0  ;;  %vm1530_vm7 = vcmp.eq.s32.totalorder (!%p1898_p6), %v2978_v2, %v2982_v4 }
 0x183   : > { %2021 = vmatpush3.bf16.msra.mxu0 (!%p1898_p6), %v2322_v24  ;;  %2274 = vset.pattern.permute.xlu0 (!%p1898_p6), %v2634_v27  ;;  %v3030_v30 = vld [vmem:[#allocation7] sm:$0xff] (!%p1898_p6)  ;;  %v2328_v35 = vld [vmem:[%s3004_s29 + $0x30] sm:$0xff] (!%p1898_p6)   ;;  %v717_v38 = vld [vmem:[#allocation2 + $0x8] sm:$0xff] (!%p1898_p6)  ;;  %s2637_s9 = smov (!%p1898_p6), 96  }
 0x184   : > { %2022 = vmatprep.subr.bf16.mxu0 (!%p1898_p6), %v2632_v25  ;;  %v2329_v36 = vld [vmem:[%s3004_s29 + $0x38] sm:$0xff] (!%p1898_p6)   ;;  %v2330_v42 = vld [vmem:[%s3008_s26] sm:$0xff] (!%p1898_p6)   ;;  %v2331_v43 = vld [vmem:[%s3008_s26 + $0x8] sm:$0xff] (!%p1898_p6)   ;;  %vm835_vm5 = vcmp.eq.s32.totalorder (!%p1898_p6), %v3075_v5, 32 }
 0x185   : > { %v716_v37 = vld [vmem:[#allocation2] sm:$0xff] (!%p1898_p6)  ;;  %2058 = vmatprep.subr.bf16.mxu1 (!%p1898_p6), %v2330_v42  ;;  %v2332_v45 = vld [vmem:[%s3008_s26 + $0x10] sm:$0xff] (!%p1898_p6)   ;;  %v2335_v48 = vld [vmem:[%s3008_s26 + $0x28] sm:$0xff] (!%p1898_p6)  }
 0x186   : > { %v3032_v31 = vld [vmem:[#allocation7 + $0x8] sm:$0xff] (!%p1898_p6)  ;;  %v718_v39 = vpack.c.bf16 (!%p1898_p6), %v717_v38, %v716_v37  ;;  %2059 = vmatpush3.bf16.msra.mxu1 (!%p1898_p6), %v2330_v42  ;;  %v2333_v46 = vld [vmem:[%s3008_s26 + $0x18] sm:$0xff] (!%p1898_p6)   ;;  %v2336_v49 = vld [vmem:[%s3008_s26 + $0x30] sm:$0xff] (!%p1898_p6)  }
 0x187   : > { %2023 = vmatpush3.bf16.msra.mxu0 (!%p1898_p6), %v2323_v26  ;;  %v2275_v32 = vpack.i.bf16 (!%p1898_p6), %v3032_v31, %v3030_v30  ;;  %v2338_v44 = vld [vmem:[%s2967_s14] sm:$0xff] (!%p1898_p6)   ;;  %2060 = vmatprep.subr.bf16.mxu1 (!%p1898_p6), %v2331_v43  ;;  %v2337_v50 = vld [vmem:[%s3008_s26 + $0x38] sm:$0xff] (!%p1898_p6)   ;;  %v2339_v52 = vld [vmem:[%s2967_s14 + $0x8] sm:$0xff] (!%p1898_p6)   ;;  %v2635_v26 = vmov (!%p1898_p6), 32  }
 0x188   : > { %2024 = vmatprep.subr.bf16.mxu0 (!%p1898_p6), %v2632_v25  ;;  %2074 = vmatprep.mubr.bf16.mxu1 (!%p1898_p6), %v2338_v44  ;;  %v2334_v47 = vld [vmem:[%s3008_s26 + $0x20] sm:$0xff] (!%p1898_p6)   ;;  %v2342_v53 = vld [vmem:[%s2967_s14 + $0x10] sm:$0xff] (!%p1898_p6)   ;;  %v2341_v54 = vld [vmem:[%s3006_s30 + $0x8] sm:$0xff] (!%p1898_p6)  }
 0x189   : > { %2276 = vperm.xlu0 %2274, %v2275_v32   ;;  %v2340_v51 = vld [vmem:[%s3006_s30] sm:$0xff]   ;;  %v2344_v55 = vld [vmem:[%s3006_s30 + $0x10] sm:$0xff]   ;;  %v2343_v56 = vld [vmem:[%s2967_s14 + $0x18] sm:$0xff]   ;;  %2280 = vset.pattern.permute.xlu1 %v2635_v26 }
 0x18a   : > { %2061 = vmatpush3.bf16.msra.mxu1 %v2331_v43  ;;  %v2346_v57 = vld [vmem:[%s2967_s14 + $0x20] sm:$0xff]   ;;  %v2345_v58 = vld [vmem:[%s3006_s30 + $0x18] sm:$0xff]   ;;  %v2347_v60 = vld [vmem:[%s2967_s14 + $0x28] sm:$0xff]  }
 0x18b   : > { %2025 = vmatpush3.bf16.msra.mxu0 %v2324_v28  ;;  %2062 = vmatprep.subr.bf16.mxu1 %v2332_v45  ;;  %v2348_v59 = vld [vmem:[%s3006_s30 + $0x20] sm:$0xff]   ;;  %v2350_v61 = vld [vmem:[%s2967_s14 + $0x30] sm:$0xff]   ;;  %v2349_v62 = vld [vmem:[%s3006_s30 + $0x28] sm:$0xff]  }
 0x18c   : > { %2026 = vmatprep.subr.bf16.mxu0 %v2632_v25  ;;  %v2352_v63 = vld [vmem:[%s3006_s30 + $0x30] sm:$0xff]   ;;  %v2351_v3 = vld [vmem:[%s2967_s14 + $0x38] sm:$0xff]   ;;  %vm1944_vm8 = vmpackc.low %vm1530_vm7, %vm1529_vm6 }
 0x18d   : > { %v1899_v7 = vld [vmem:[%s624_s6] ss:$0 sm:$0xff] }
 0x18e   : > { %2063 = vmatpush3.bf16.msra.mxu1 %v2332_v45  ;;  %v2353_v24 = vld [vmem:[%s3006_s30 + $0x38] sm:$0xff]  }
 0x18f   : > { %2027 = vmatpush3.bf16.msra.mxu0 %v2325_v29  ;;  %2064 = vmatprep.subr.bf16.mxu1 %v2333_v46 }
 0x190   : > { %2028 = vmatprep.subr.bf16.mxu0 %v2632_v25 }
 0x192   : > { %2065 = vmatpush3.bf16.msra.mxu1 %v2333_v46 }
 0x193   : > { %2029 = vmatpush3.bf16.msra.mxu0 %v2326_v33  ;;  %2066 = vmatprep.subr.bf16.mxu1 %v2334_v47 }
 0x194   : > { %2030 = vmatprep.subr.bf16.mxu0 %v2632_v25 }
 0x196   : > { %2067 = vmatpush3.bf16.msra.mxu1 %v2334_v47 }
 0x197   : > { %2031 = vmatpush3.bf16.msra.mxu0 %v2327_v34  ;;  %2068 = vmatprep.subr.bf16.mxu1 %v2335_v48 }
 0x198   : > { %2032 = vmatprep.subr.bf16.mxu0 %v2632_v25 }
 0x19a   : > { %2069 = vmatpush3.bf16.msra.mxu1 %v2335_v48 }
 0x19b   : > { %2033 = vmatpush3.bf16.msra.mxu0 %v2328_v35  ;;  %2070 = vmatprep.subr.bf16.mxu1 %v2336_v49 }
 0x19c   : > { %2034 = vmatprep.subr.bf16.mxu0 %v2632_v25 }
 0x19e   : > { %2071 = vmatpush3.bf16.msra.mxu1 %v2336_v49 }
 0x19f   : > { %2035 = vmatpush3.bf16.msra.mxu0 %v2329_v36  ;;  %2072 = vmatprep.subr.bf16.mxu1 %v2337_v50 }
 0x1a2   : > { %2037 = vmatmul.mubr.bf16.vlgmr.msra.gmra.mrb[0].mxu0 %v718_v39  ;;  %2073 = vmatpush3.bf16.msra.mxu1 %v2337_v50 }
 0x1a3   : > { %2090 = vmatprep.subr.bf16.mxu1 %v2340_v51 }
 0x1a5   : > { %2075 = vmatmul.mubr.bf16.vlgmr.msra.gmra.mrb[0].mxu1 %v2339_v52 }
 0x1a6   : > { %2091 = vmatpush3.bf16.msra.mxu1 %v2340_v51  ;;  %2078 = vmatprep.mubr.bf16.mxu1 %v2342_v53 }
 0x1a7   : > { %855 = vxpose.xlu0.c.b16.start.end [1/1] (short) %v668_v8, 128  ;;  %2092 = vmatprep.subr.bf16.mxu1 %v2341_v54 }
 0x1aa   : > { %2093 = vmatpush3.bf16.msra.mxu1 %v2341_v54 }
 0x1ab   : > { %2094 = vmatprep.subr.bf16.mxu1 %v2344_v55 }
 0x1ad   : > { %2079 = vmatmul.mubr.bf16.gmra.mrb[4].mxu1 %v2343_v56 }
 0x1ae   : > { %2095 = vmatpush3.bf16.msra.mxu1 %v2344_v55  ;;  %2082 = vmatprep.mubr.bf16.mxu1 %v2346_v57 }
 0x1af   : > { %2096 = vmatprep.subr.bf16.mxu1 %v2345_v58 }
 0x1b2   : > { %2097 = vmatpush3.bf16.msra.mxu1 %v2345_v58 }
 0x1b3   : > { %2098 = vmatprep.subr.bf16.mxu1 %v2348_v59 }
 0x1b5   : > { %2083 = vmatmul.mubr.bf16.gmra.mrb[8].mxu1 %v2347_v60 }
 0x1b6   : > { %2099 = vmatpush3.bf16.msra.mxu1 %v2348_v59  ;;  %2086 = vmatprep.mubr.bf16.mxu1 %v2350_v61 }
 0x1b7   : > { %2100 = vmatprep.subr.bf16.mxu1 %v2349_v62 }
 0x1ba   : > { %2101 = vmatpush3.bf16.msra.mxu1 %v2349_v62 }
 0x1bb   : > { %2102 = vmatprep.subr.bf16.mxu1 %v2352_v63 }
 0x1bd   : > { %2087 = vmatmul.mubr.bf16.gmra.mrb[12].mxu1 %v2351_v3 }
 0x1be   : > { %2103 = vmatpush3.bf16.msra.mxu1 %v2352_v63 }
 0x1bf   : > { %2104 = vmatprep.subr.bf16.mxu1 %v2353_v24 }
 0x1c2   : > { %2105 = vmatpush3.bf16.msra.mxu1 %v2353_v24 }
 0x208   : > { %v3048_v40 = vpop.permute.xlu0 %2276 }
 0x209   : > { %v2278_v8 = vunpack.i.l.bf16 %v3048_v40  ;;  %v2279_v10 = vunpack.i.h.bf16 %v3048_v40 }
 0x20d   : > { %v863_v41 = vpop.trf.xlu0 }
 0x20e   : > { %2042 = vmatprep.mubr.msk.bf16.mxu0 %vm871_vm4, %v863_v41 }
 0x211   : > { %v864_v6 = vpop.trf.xlu0 }
 0x215   : > { %v865_v14 = vpop.trf.xlu0 }
 0x219   : > { %v866_v19 = vpop.trf.xlu0 }
 0x21d   : > { %v867_v20 = vpop.trf.xlu0 }
 0x221   : > { %v868_v21 = vpop.trf.xlu0 }
 0x225   : > { %v869_v22 = vpop.trf.xlu0 }
 0x229   : > { %v870_v23 = vpop.trf.xlu0 }
 0x275   : > { %v824_v9 = vpop.f32.mrb[0].mxu0 }
 0x276   : > { %v3085_v11 = vadd.f32 %v1899_v7, %v824_v9  ;;  %v2038_v12 = vpop.f32.mrb[1].mxu0 }
 0x277   : > { %v827_v13 = vpop.f32.mrb[2].mxu0 }
 0x278   : > { %v3087_v0 = vadd.f32 %v1899_v7, %v827_v13  ;;  %v2039_v15 = vpop.f32.mrb[3].mxu0  ;;  %v848_v16 = vsel %vm835_vm5, %v2278_v8, %v3085_v11 }
 0x27a   : > { %v849_v17 = vsel %vm835_vm5, %v2279_v10, %v3087_v0 }
 0x27b   : > { %v850_v18 = vpack.c.bf16 %v849_v17, %v848_v16 }
 0x27d   : > { %2040 = vmatprep.subr.bf16.mxu0 %v850_v18 }
 0x27e   : > { %2041 = vmatpush3.bf16.msra.mxu0 %v850_v18 }
 0x27f   : > { %2122 = vmatprep.subr.bf16.mxu0 %v2632_v25 }
 0x281   : > { %2043 = vmatmul.mubr.msk.bf16.vlgmr.msra.gmra.mrb[4].mxu0 %vm871_vm4, %v864_v6  ;;  %v3112_v6 = vld [vmem:[%s648_s24] ss:$0 sm:$0xff] }
 0x282   : > { %2046 = vmatprep.mubr.msk.bf16.mxu0 %vm871_vm4, %v865_v14 }
 0x289   : > { %2047 = vmatmul.mubr.msk.bf16.gmra.mrb[8].mxu0 %vm871_vm4, %v866_v19 }
 0x28a   : > { %2050 = vmatprep.mubr.msk.bf16.mxu0 %vm871_vm4, %v867_v20 }
 0x291   : > { %2051 = vmatmul.mubr.msk.bf16.gmra.mrb[12].mxu0 %vm871_vm4, %v868_v21 }
 0x292   : > { %2054 = vmatprep.mubr.msk.bf16.mxu0 %vm871_vm4, %v869_v22 }
 0x299   : > { %2055 = vmatmul.mubr.msk.bf16.gmra.mrb[16].mxu0 %vm871_vm4, %v870_v23 }
 0x29a   : > { %2138 = vmatprep.mubr.msk.bf16.mxu0 %vm2633_vm3, %v2632_v25 }
 0x354   : > { %v2044_v28 = vpop.f32.mrb[4].mxu0 }
 0x355   : > { %v930_v29 = vpop.f32.mrb[5].mxu0 }
 0x356   : > { %v2045_v32 = vpop.f32.mrb[6].mxu0 }
 0x357   : > { %v2286_v33 = vpack.i.bf16 %v2045_v32, %v2044_v28  ;;  %v994_v34 = vpack.c.bf16 %v2045_v32, %v2044_v28  ;;  %v933_v35 = vpop.f32.mrb[7].mxu0 }
 0x358   : > { %v993_v36 = vpack.c.bf16 %v933_v35, %v930_v29  ;;  %v2281_v37 = vpack.i.bf16 %v933_v35, %v930_v29 }
 0x35a   : > { %2282 = vperm.xlu1 %2280, %v2281_v37   ;;  %2106 = vmatprep.mubr.bf16.mxu1 %v993_v36 }
 0x35b   : > { %2107 = vmatmul.mubr.bf16.vlgmr.msra.gmra.mrb[0].mxu1 %v994_v34 }
 0x35c   : > { %v2048_v38 = vpop.f32.mrb[8].mxu0 }
 0x35d   : > { %v946_v39 = vpop.f32.mrb[9].mxu0 }
 0x35e   : > { %2287 = vperm.xlu1 %2280, %v2286_v33   ;;  %v2049_v40 = vpop.f32.mrb[10].mxu0 }
 0x35f   : > { %v2296_v41 = vpack.i.bf16 %v2049_v40, %v2048_v38  ;;  %v996_v42 = vpack.c.bf16 %v2049_v40, %v2048_v38  ;;  %v949_v43 = vpop.f32.mrb[11].mxu0 }
 0x360   : > { %v2291_v44 = vpack.i.bf16 %v949_v43, %v946_v39  ;;  %v995_v45 = vpack.c.bf16 %v949_v43, %v946_v39 }
 0x362   : > { %2292 = vperm.xlu1 %2280, %v2291_v44   ;;  %2110 = vmatprep.mubr.bf16.mxu1 %v995_v45 }
 0x363   : > { %2111 = vmatmul.mubr.bf16.gmra.mrb[4].mxu1 %v996_v42 }
 0x364   : > { %v2052_v46 = vpop.f32.mrb[12].mxu0 }
 0x365   : > { %v962_v47 = vpop.f32.mrb[13].mxu0 }
 0x366   : > { %2297 = vperm.xlu1 %2280, %v2296_v41   ;;  %v2053_v48 = vpop.f32.mrb[14].mxu0 }
 0x367   : > { %v2306_v49 = vpack.i.bf16 %v2053_v48, %v2052_v46  ;;  %v998_v50 = vpack.c.bf16 %v2053_v48, %v2052_v46  ;;  %v965_v51 = vpop.f32.mrb[15].mxu0 }
 0x368   : > { %v2301_v52 = vpack.i.bf16 %v965_v51, %v962_v47  ;;  %v997_v53 = vpack.c.bf16 %v965_v51, %v962_v47 }
 0x36a   : > { %2302 = vperm.xlu1 %2280, %v2301_v52   ;;  %2114 = vmatprep.mubr.bf16.mxu1 %v997_v53 }
 0x36b   : > { %2115 = vmatmul.mubr.bf16.gmra.mrb[8].mxu1 %v998_v50 }
 0x36c   : > { %v2056_v54 = vpop.f32.mrb[16].mxu0 }
 0x36d   : > { %v978_v55 = vpop.f32.mrb[17].mxu0 }
 0x36e   : > { %2307 = vperm.xlu1 %2280, %v2306_v49   ;;  %v2057_v56 = vpop.f32.mrb[18].mxu0 }
 0x36f   : > { %v2316_v57 = vpack.i.bf16 %v2057_v56, %v2056_v54  ;;  %v1000_v58 = vpack.c.bf16 %v2057_v56, %v2056_v54  ;;  %v981_v59 = vpop.f32.mrb[19].mxu0 }
 0x370   : > { %v2311_v60 = vpack.i.bf16 %v981_v59, %v978_v55  ;;  %v999_v61 = vpack.c.bf16 %v981_v59, %v978_v55 }
 0x372   : > { %2312 = vperm.xlu1 %2280, %v2311_v60   ;;  %2118 = vmatprep.mubr.bf16.mxu1 %v999_v61 }
 0x373   : > { %2119 = vmatmul.mubr.bf16.gmra.mrb[12].mxu1 %v1000_v58 }
 0x376   : > { %2317 = vperm.xlu1 %2280, %v2316_v57  }
 0x37a   : > { %2321 = vset.pattern.permute.xlu1 %v2634_v27 }
 0x3d9   : > { %v2283_v62 = vpop.permute.xlu1 %2282 }
 0x3da   : > { %v2285_v21 = vunpack.i.h.bf16 %v2283_v62  ;;  %v2284_v22 = vunpack.i.l.bf16 %v2283_v62 }
 0x3dd   : > { %v2288_v63 = vpop.permute.xlu1 %2287 }
 0x3de   : > { %v2290_v18 = vunpack.i.h.bf16 %v2288_v63  ;;  %v2289_v19 = vunpack.i.l.bf16 %v2288_v63 }
 0x3e1   : > { %v2293_v3 = vpop.permute.xlu1 %2292 }
 0x3e2   : > { %v2295_v48 = vunpack.i.h.bf16 %v2293_v3  ;;  %v2294_v49 = vunpack.i.l.bf16 %v2293_v3 }
 0x3e5   : > { %v2298_v10 = vpop.permute.xlu1 %2297 }
 0x3e6   : > { %v2300_v45 = vunpack.i.h.bf16 %v2298_v10  ;;  %v2299_v46 = vunpack.i.l.bf16 %v2298_v10 }
 0x3e9   : > { %v2303_v28 = vpop.permute.xlu1 %2302 }
 0x3ed   : > { %v2308_v50 = vpop.permute.xlu1 %2307 }
 0x42e   : > { %v2108_v7 = vpop.f32.mrb[0].mxu1 }
 0x42f   : > { %v1396_v8 = vadd.f32 %v2108_v7, %v3112_v6  ;;  %v1324_v9 = vpop.f32.mrb[1].mxu1 }
 0x430   : > { %v1394_v12 = vadd.f32 %v3112_v6, %v1324_v9  ;;  %v2109_v13 = vpop.f32.mrb[2].mxu1 }
 0x431   : > { %v1412_v14 = vmax.f32 %v1396_v8, 0.0  ;;  %v1397_v27 = vadd.f32 %v2109_v13, %v3112_v6  ;;  %v1327_v15 = vpop.f32.mrb[3].mxu1  ;;  %v2313_v8 = vpop.permute.xlu1 %2312  ;;  %v2309_v13 = vunpack.i.l.bf16 %v2308_v50 }
 0x432   : > { %v1410_v16 = vmax.f32 %v1394_v12, 0.0  ;;  %v1395_v17 = vadd.f32 %v3112_v6, %v1327_v15  ;;  %v2310_v12 = vunpack.i.h.bf16 %v2308_v50  ;;  %v2304_v15 = vunpack.i.l.bf16 %v2303_v28 }
 0x433   : > { %v1413_v20 = vmax.f32 %v1397_v27, 0.0  ;;  %v1511_v24 = vsel %vm835_vm5, %v2289_v19, %v1412_v14  ;;  %v2305_v27 = vunpack.i.h.bf16 %v2303_v28 }
 0x434   : > { %v1411_v23 = vmax.f32 %v1395_v17, 0.0  ;;  %v1509_v29 = vsel %vm835_vm5, %v2284_v22, %v1410_v16 }
 0x435   : > { %v1512_v26 = vsel %vm835_vm5, %v2290_v18, %v1413_v20  ;;  %v2318_v28 = vpop.permute.xlu1 %2317 }
 0x436   : > { %v1539_v32 = vpack.c.bf16 %v1512_v26, %v1511_v24  ;;  %v1510_v33 = vsel %vm835_vm5, %v2285_v21, %v1411_v23  ;;  %v2112_v34 = vpop.f32.mrb[4].mxu1 }
 0x437   : > { %v1538_v35 = vpack.c.bf16 %v1510_v33, %v1509_v29  ;;  %v1400_v36 = vadd.f32 %v2112_v34, %v3112_v6  ;;  %v1340_v37 = vpop.f32.mrb[5].mxu1 }
 0x438   : > { %v1398_v38 = vadd.f32 %v3112_v6, %v1340_v37  ;;  %v2113_v39 = vpop.f32.mrb[6].mxu1 }
 0x439   : > { %v1416_v40 = vmax.f32 %v1400_v36, 0.0  ;;  %v1401_v41 = vadd.f32 %v2113_v39, %v3112_v6  ;;  %v1343_v42 = vpop.f32.mrb[7].mxu1  ;;  %2123 = vmatpush3.bf16.msra.mxu0 %v1538_v35  ;;  %v2319_v39 = vunpack.i.l.bf16 %v2318_v28 }
 0x43a   : > { %v1414_v43 = vmax.f32 %v1398_v38, 0.0  ;;  %v1399_v44 = vadd.f32 %v3112_v6, %v1343_v42  ;;  %2124 = vmatprep.subr.bf16.mxu0 %v2632_v25  ;;  %v2320_v38 = vunpack.i.h.bf16 %v2318_v28  ;;  %v2314_v42 = vunpack.i.l.bf16 %v2313_v8 }
 0x43b   : > { %v1417_v47 = vmax.f32 %v1401_v41, 0.0  ;;  %v1515_v52 = vsel %vm835_vm5, %v2299_v46, %v1416_v40  ;;  %v2315_v41 = vunpack.i.h.bf16 %v2313_v8 }
 0x43c   : > { %v1415_v51 = vmax.f32 %v1399_v44, 0.0  ;;  %v1513_v54 = vsel %vm835_vm5, %v2294_v49, %v1414_v43  ;;  %v2636_v49 = vmov 1.0|1.0  }
 0x43d   : > { %v1516_v53 = vsel %vm835_vm5, %v2300_v45, %v1417_v47  ;;  %2125 = vmatpush3.bf16.msra.mxu0 %v1539_v32 }
 0x43e   : > { %v1541_v55 = vpack.c.bf16 %v1516_v53, %v1515_v52  ;;  %v1514_v56 = vsel %vm835_vm5, %v2295_v48, %v1415_v51  ;;  %v2116_v57 = vpop.f32.mrb[8].mxu1  ;;  %2126 = vmatprep.subr.bf16.mxu0 %v2632_v25  ;;  %v1633_v51 = vmul.f32 %v3030_v30, %v3030_v30 }
 0x43f   : > { %v1540_v58 = vpack.c.bf16 %v1514_v56, %v1513_v54  ;;  %v1404_v59 = vadd.f32 %v2116_v57, %v3112_v6  ;;  %v1356_v60 = vpop.f32.mrb[9].mxu1  ;;  %v1634_v54 = vmul.f32 %v3032_v31, %v3032_v31 }
 0x440   : > { %v1402_v61 = vadd.f32 %v3112_v6, %v1356_v60  ;;  %v2117_v62 = vpop.f32.mrb[10].mxu1 }
 0x441   : > { %v1420_v63 = vmax.f32 %v1404_v59, 0.0  ;;  %v1405_v3 = vadd.f32 %v2117_v62, %v3112_v6  ;;  %v1359_v7 = vpop.f32.mrb[11].mxu1  ;;  %2127 = vmatpush3.bf16.msra.mxu0 %v1540_v58 }
 0x442   : > { %v1418_v9 = vmax.f32 %v1402_v61, 0.0  ;;  %v1403_v10 = vadd.f32 %v3112_v6, %v1359_v7  ;;  %2128 = vmatprep.subr.bf16.mxu0 %v2632_v25 }
 0x443   : > { %v1421_v14 = vmax.f32 %v1405_v3, 0.0  ;;  %v1519_v17 = vsel %vm835_vm5, %v2309_v13, %v1420_v63 }
 0x444   : > { %v1419_v16 = vmax.f32 %v1403_v10, 0.0  ;;  %v1517_v19 = vsel %vm835_vm5, %v2304_v15, %v1418_v9 }
 0x445   : > { %v1520_v18 = vsel %vm835_vm5, %v2310_v12, %v1421_v14  ;;  %2129 = vmatpush3.bf16.msra.mxu0 %v1541_v55  ;;  %v1946_v55 = vld [vmem:[%s633_s25] ss:$0 sm:$0xff] }
 0x446   : > { %v1543_v20 = vpack.c.bf16 %v1520_v18, %v1519_v17  ;;  %v1518_v21 = vsel %vm835_vm5, %v2305_v27, %v1419_v16  ;;  %v2120_v22 = vpop.f32.mrb[12].mxu1  ;;  %2130 = vmatprep.subr.bf16.mxu0 %v2632_v25  ;;  %v1629_v56 = vadd.f32 %v1946_v55, %v3085_v11  ;;  %v1630_v61 = vadd.f32 %v1946_v55, %v3087_v0 }
 0x447   : > { %v1542_v23 = vpack.c.bf16 %v1518_v21, %v1517_v19  ;;  %v1408_v24 = vadd.f32 %v2120_v22, %v3112_v6  ;;  %v1372_v26 = vpop.f32.mrb[13].mxu1 }
 0x448   : > { %v1406_v29 = vadd.f32 %v3112_v6, %v1372_v26  ;;  %v2121_v32 = vpop.f32.mrb[14].mxu1  ;;  %v1631_v58 = vmax.f32 %v1629_v56, 0.0 }
 0x449   : > { %v1424_v33 = vmax.f32 %v1408_v24, 0.0  ;;  %v1409_v34 = vadd.f32 %v2121_v32, %v3112_v6  ;;  %v1375_v35 = vpop.f32.mrb[15].mxu1  ;;  %2131 = vmatpush3.bf16.msra.mxu0 %v1542_v23 }
 0x44a   : > { %v1422_v36 = vmax.f32 %v1406_v29, 0.0  ;;  %v1407_v37 = vadd.f32 %v3112_v6, %v1375_v35  ;;  %2132 = vmatprep.subr.bf16.mxu0 %v2632_v25 }
 0x44b   : > { %v1425_v40 = vmax.f32 %v1409_v34, 0.0  ;;  %v1523_v44 = vsel %vm835_vm5, %v2319_v39, %v1424_v33 }
 0x44c   : > { %v1423_v43 = vmax.f32 %v1407_v37, 0.0  ;;  %v1521_v46 = vsel %vm835_vm5, %v2314_v42, %v1422_v36 }
 0x44d   : > { %v1524_v45 = vsel %vm835_vm5, %v2320_v38, %v1425_v40  ;;  %2133 = vmatpush3.bf16.msra.mxu0 %v1543_v20 }
 0x44e   : > { %v1545_v47 = vpack.c.bf16 %v1524_v45, %v1523_v44  ;;  %v1522_v6 = vsel %vm835_vm5, %v2315_v41, %v1423_v43  ;;  %2134 = vmatprep.subr.bf16.mxu0 %v2632_v25 }
 0x44f   : > { %v1544_v48 = vpack.c.bf16 %v1522_v6, %v1521_v46 }
 0x451   : > { %2135 = vmatpush3.bf16.msra.mxu0 %v1544_v48 }
 0x452   : > { %2136 = vmatprep.subr.bf16.mxu0 %v2632_v25 }
 0x455   : > { %2137 = vmatpush3.bf16.msra.mxu0 %v1545_v47 }
 0x458   : > { %2139 = vmatmul.mubr.msk.bf16.vlgmr.msra.gmra.mrb[20].mxu0 %vm1944_vm8, %v2636_v49 }
 0x52b   : > { %v1580_v50 = vpop.f32.mrb[20].mxu0 }
 0x52c   : > { %1600 = vrot.lane.b32.xlu1 %v1580_v50, %s2637_s9  ;;  %v2140_v5 = vpop.f32.mrb[21].mxu0 }
 0x52d   : > { %v1583_v52 = vpop.f32.mrb[22].mxu0 }
 0x52e   : > { %1602 = vrot.lane.b32.xlu0 %v1583_v52, %s2637_s9  ;;  %v2141_v25 = vpop.f32.mrb[23].mxu0 }
 0x530   : > { %1637 = vperm.xlu1 %2321, %v1633_v51  }
 0x59e   : > { %v1601_v1 = vpop.permute.xlu1 %1600 }
 0x59f   : > { %v1606_v53 = vmul.f32 %v1601_v1, %v3030_v30 }
 0x5a0   : > { %v1603_v2 = vpop.permute.xlu0 %1602 }
 0x5a1   : > { %1610 = vperm.xlu1 %2321, %v1606_v53   ;;  %v1607_v4 = vmul.f32 %v1603_v2, %v3032_v31  ;;  %v1632_v31 = vmax.f32 %v1630_v61, 0.0 }
 0x5a5   : > { %1615 = vperm.xlu1 %2321, %v1607_v4  }
 0x5a9   : > { %1642 = vperm.xlu1 %2321, %v1634_v54  }
 0x5af   : > { %v1638_v57 = vpop.permute.xlu1 %1637 }
 0x5b0   : > { %v1645_v30 = vmul.f32 %v1638_v57, %v1631_v58 }
 0x620   : > { %v1611_v59 = vpop.permute.xlu1 %1610 }
 0x621   : > { %v1618_v60 = vadd.f32 %v1611_v59, %v1580_v50 }
 0x623   : > { %v1647_v62 = vadd.f32 %v1645_v30, %v1618_v60 }
 0x624   : > { %v1616_v63 = vpop.permute.xlu1 %1615 }
 0x625   : > { %v1649_v3 = vmax.f32 %v1647_v62, 0.0  ;;  %1653 = vst [vmem:[#allocation17] sm:$0xff] %v1647_v62  ;;  %v1619_v8 = vadd.f32 %v1616_v63, %v1583_v52 }
 0x627   : > { %1651 = vst [vmem:[#allocation2] sm:$0xff] %v1649_v3 }
 0x628   : > { %v1643_v7 = vpop.permute.xlu1 %1642 }
 0x629   : > { %v1646_v9 = vmul.f32 %v1643_v7, %v1632_v31 }
 0x62b   : > { %v1648_v10 = vadd.f32 %v1646_v9, %v1619_v8 }
 0x62d   : > { %v1650_v12 = vmax.f32 %v1648_v10, 0.0  ;;  %1654 = vst [vmem:[#allocation17 + $0x8] sm:$0xff] %v1648_v10 }
 0x62f   : > { %1652 = vst [vmem:[#allocation2 + $0x8] sm:$0xff] %v1650_v12 }
 0x630 PF: > { %p2203_p1 = scmp.eq.s32.totalorder %s2720_s15, 3  ;;  %s2638_s20 = smov [#allocation17]  }
 0x631   : > { %s1661_s18 = sshll.u32 %s2638_s20, 4  ;;  %s1662_s18 = int_to_ptr.vmem [resolvable:$true] %s1661_s18 }
 0x632   : > { %s2530_s14 = scalar_lea.vmem %s1662_s18, 256  ;;  %p2537_p2 = scmp.lt.s32.totalorder %s1662_s18, %s1662_s18 }
 0x633   : > { %p2531_p7 = scmp.ne.s32.totalorder %s1662_s18, %s2530_s14  ;;  %p2538_p0 = scmp.lt.s32.totalorder %s2530_s14, %s2530_s14 }
 0x635   : > { %p2532_p11 = pnand %p2531_p7, %p2203_p1  ;;  %p2539_p10 = por %p2538_p0, %p2537_p2 }
 0x637   : > { %p2533_p9 = pneg %p2532_p11 }
 0x639   : > { %p2540_p4 = pnand %p2539_p10, %p2533_p9 }
 0x63b   : > { %2543 = shalt.err (!%p2540_p4)
}
 0x63c   : > { %s3282_s19 = sld [smem:[#allocation30_spill]] }
 0x642   : > { %s2544_s6 = scalar_lea.hbm %s3282_s19, 256 }
 0x643   : > { %p2545_p13 = scmp.ne.s32.totalorder %s3282_s19, %s2544_s6  ;;  %p2550_p8 = scmp.lt.u32.totalorder %s2544_s6, %s3282_s19 }
 0x645   : > { %p2546_p5 = pnand %p2545_p13, %p2203_p1 }
 0x647   : > { %p2547_p3 = pneg %p2546_p5 }
 0x649   : > { %p2552_p12 = pnand %p2550_p8, %p2547_p3 }
 0x64b   : > { %2555 = shalt.err (!%p2552_p12)
}
 0x64c   : > { %s2639_s21 = smov 128   ;;  %s2640_s24 = smov 8  }
 0x64d   : > { %2175 = dma.vmem_to_hbm [thread:$0]  (%p2203_p1), %s1662_s18, 256, %s3282_s19, [#allocation10], %s2639_s21, %s2639_s21, %s2640_s24  }
 0x64e   : > { %2593 = dma.done.wait (%p2203_p1), [#allocation10], 256  }
 0x64f   : > { %2595 = vsyncadd (%p2203_p1), [#allocation10], 4294967040 }
 0x650 PF: > { %s3283_s26 = sld [smem:[#allocation23_spill]]  ;;  %s3284_s12 = sld [smem:[#allocation25_spill]] }
 0x651   : > { %s3285_s16 = sld [smem:[#allocation22_spill]]  ;;  %s3286_s13 = sld [smem:[#allocation24_spill]] }
 0x652   : > { %s3287_s30 = smov %s2602_s10  ;;  %s3288_s10 = smov %s2606_s11 }
 0x656   : > { %s22_s14 = sadd.s32 1, %s3283_s26   ;;  %s3289_s11 = smov %s3284_s12 }
 0x657   : > { %p19_p6 = scmp.ge.s32.totalorder %s22_s14, 6   ;;  %s3290_s12 = smov %s3285_s16 }
 0x659   :  { %21 = sbr.rel (!%p19_p6) target bundleno = 11 (0xb), region = 167 }
 0x660   :  { %1677 = vsyncpa [#allocation9], 1 }
 0x661   :  { %1679 = vsyncpa [#allocation9 + $0x1], 1 }
 0x662   :  { %1680 = vsyncpa [#allocation12], 1 }
 0x663   :  { %1681 = vsyncpa [#allocation10], 1 }
 0x664   :  { %1683 = vsyncpa [#allocation10 + $0x1], 1 }

</bundles_post_ra>
